<compile_context>
chip_gen: v7x
topology: tpu7x:2x2x1
jax: 0.10.0
libtpu: 0.0.40
codegen_flags: <defaults>
</compile_context>

<pallas_src>
import jax
import jax.numpy as jnp
from jax.experimental import pallas as pl
from jax.experimental.pallas import tpu as pltpu


def _layernorm(x, g, b, eps=1e-5):
    mu = jnp.mean(x, axis=-1, keepdims=True)
    var = jnp.mean(jnp.square(x - mu), axis=-1, keepdims=True)
    return (x - mu) * jax.lax.rsqrt(var + eps) * g + b


def _pack_rows(sections, row_align, lane_w, dtype):
    """Stack named 2-D sections into one (R, lane_w) slab (single DMA).

    Every section starts at a row offset that is a multiple of `row_align`
    (sublane-aligned static slices in the kernel) and is zero-padded to
    `lane_w` lanes.  Returns (slab, {name: (row_offset, rows, cols)}).
    """
    blocks, meta, off = [], {}, 0
    for name, arr in sections:
        r, c = arr.shape
        meta[name] = (off, r, c)
        rp = -(-r // row_align) * row_align
        blocks.append(jnp.pad(arr.astype(jnp.float32),
                              ((0, rp - r), (0, lane_w - c))))
        off += rp
    return jnp.concatenate(blocks, axis=0).astype(dtype), meta


def _make_kernel(*, B, B_pad, Ns, H, S, w_meta, v_meta):
    f32, bf16 = jnp.float32, jnp.bfloat16
    SB = S * B_pad

    def kernel(x_ref, w_ref, v_ref, o_ref):
        def wsec(name):
            off, r, c = w_meta[name]
            return w_ref[off:off + r, 0:c]

        def vsec(name):
            off, r, c = v_meta[name]
            return v_ref[off:off + r, 0:c]

        # -------- encoder: lane-dense (B_pad, Ns*H), block-diag Linears, folded BN --------
        h = jnp.dot(x_ref[...], wsec("w1bd"), preferred_element_type=f32)
        h = jnp.maximum(h * vsec("s1") + vsec("t1"), 0.0)
        h = jnp.dot(h.astype(bf16), wsec("w2bd"), preferred_element_type=f32)
        h = jnp.maximum(h * vsec("s2") + vsec("t2"), 0.0)

        # -------- token slab, slot-major (S*B_pad, H), built in registers --------
        parts = [jnp.broadcast_to(vsec("agg"), (B_pad, H))]       # slot 0 = aggregator
        for s in range(Ns):
            parts.append(h[:, s * H:(s + 1) * H])                  # slot s+1 = sensor s
        tok = jnp.concatenate(parts, axis=0)                       # (SB, H) f32

        # -------- single-head self-attention over the batch axis, per token slot --------
        qkv = jnp.dot(tok.astype(bf16), wsec("wqkv"),
                      preferred_element_type=f32) + vsec("bqkv")   # (SB, 3H)
        q = qkv[:, 0:H]
        k = qkv[:, H:2 * H]
        v = qkv[:, 2 * H:3 * H]

        scores = jnp.dot(q, k.T, preferred_element_type=f32) * (1.0 / (H ** 0.5))
        # mask = same token slot AND key batch row < B (padded batch rows are garbage)
        col = jax.lax.broadcasted_iota(jnp.int32, (SB, SB), 1)
        row_start = jnp.concatenate(
            [jnp.full((B_pad, 1), s * B_pad, jnp.int32) for s in range(S)], axis=0)
        valid = (col >= row_start) & (col < row_start + B)
        scores = jnp.where(valid, scores, -1e30)

        m = jnp.max(scores, axis=-1, keepdims=True)
        e = jnp.exp(scores - m)
        # approx reciprocal on the EUP: ~2^-12 relative error on the softmax denominator
        p_attn = e * pl.reciprocal(jnp.sum(e, axis=-1, keepdims=True), approx=True)

        attn = jnp.dot(p_attn, v, preferred_element_type=f32)      # (SB, H)
        attn = jnp.dot(attn.astype(bf16), wsec("woT"),
                       preferred_element_type=f32) + vsec("bo")

        # residual + LayerNorm1 (dropout = identity in eval mode)
        y = _layernorm(tok + attn, vsec("ln1w"), vsec("ln1b"))

        # feed-forward + residual + LayerNorm2
        f = jnp.maximum(jnp.dot(y.astype(bf16), wsec("wf1"),
                                preferred_element_type=f32) + vsec("bf1"), 0.0)
        f = jnp.dot(f.astype(bf16), wsec("wf2T"),
                    preferred_element_type=f32) + vsec("bf2")
        z = _layernorm(y + f, vsec("ln2w"), vsec("ln2b"))

        # slot 0 = aggregator token; padded batch rows are sliced off on the host
        o_ref[...] = z[0:B_pad, :]

    return kernel


def parking_sensor_encoder_forward(x, p):
    B, Ns, L, Fi = x.shape
    H = p["w1"].shape[0]
    F = p["ff1_w"].shape[0]
    Din = L * Fi
    NH = Ns * H
    ND = Ns * Din
    S = Ns + 1
    # bf16 operands pack 2 rows per sublane -> pad the batch to a multiple of 16
    B_pad = max(16, -(-B // 16) * 16)
    bn_eps = 1e-5
    f32, bf16 = jnp.float32, jnp.bfloat16

    # one lane width shared by every slab (>=128, covers every packed section)
    lane_w = max(128, NH, ND, 3 * H, F)
    lane_w = -(-lane_w // 128) * 128

    # ---- input slab (B_pad, lane_w) bf16; lane = sensor*Din + flattened(seq, feat) ----
    x_flat = x.reshape(B, ND)
    x_slab = jnp.zeros((B_pad, lane_w), f32).at[:B, :ND].set(x_flat).astype(bf16)

    # ---- eval BatchNorm folded to per-(sensor,feature) affine; Linear bias folded in ----
    def bn_affine(lin_b, g, be, rm, rv):
        sc = g * jax.lax.rsqrt(rv + bn_eps)                         # (Ns*H,)
        sh = be - rm * sc + jnp.tile(lin_b, Ns) * sc                # (Ns*H,)
        return sc, sh

    s1, t1 = bn_affine(p["b1"], p["bn1_g"], p["bn1_b"], p["bn1_rm"], p["bn1_rv"])
    s2, t2 = bn_affine(p["b2"], p["bn2_g"], p["bn2_b"], p["bn2_rm"], p["bn2_rv"])

    # ---- bf16 weight slab (one DMA): block-diag encoder weights + transformer weights ----
    w1_bd = jax.scipy.linalg.block_diag(*([p["w1"].T] * Ns))        # (Ns*Din, Ns*H)
    w1_bd = jnp.pad(w1_bd, ((0, lane_w - ND), (0, 0)))              # rows match x lanes
    w2_bd = jax.scipy.linalg.block_diag(*([p["w2"].T] * Ns))        # (Ns*H, Ns*H)
    w_slab, w_meta = _pack_rows(
        [("w1bd", w1_bd), ("w2bd", w2_bd),
         ("wqkv", p["in_proj_w"].T), ("woT", p["out_w"].T),
         ("wf1", p["ff1_w"].T), ("wf2T", p["ff2_w"].T)],
        row_align=16, lane_w=lane_w, dtype=bf16)

    # ---- f32 vector slab (one DMA): BN tables pre-broadcast to B_pad rows + row vectors ----
    bcast = lambda a: jnp.broadcast_to(a[None, :], (B_pad, NH))
    row = lambda a: a.reshape(1, -1)
    v_slab, v_meta = _pack_rows(
        [("s1", bcast(s1)), ("t1", bcast(t1)), ("s2", bcast(s2)), ("t2", bcast(t2)),
         ("agg", p["agg"].reshape(1, H)), ("bqkv", row(p["in_proj_b"])),
         ("bo", row(p["out_b"])), ("ln1w", row(p["ln1_w"])), ("ln1b", row(p["ln1_b"])),
         ("bf1", row(p["ff1_b"])), ("bf2", row(p["ff2_b"])),
         ("ln2w", row(p["ln2_w"])), ("ln2b", row(p["ln2_b"]))],
        row_align=8, lane_w=lane_w, dtype=f32)

    kernel = _make_kernel(B=B, B_pad=B_pad, Ns=Ns, H=H, S=S,
                          w_meta=w_meta, v_meta=v_meta)

    args = (x_slab, w_slab, v_slab)
    out = pl.pallas_call(
        kernel,
        out_shape=jax.ShapeDtypeStruct((B_pad, H), f32),
        grid=(1,),
        in_specs=[pl.BlockSpec(a.shape, lambda i: (0, 0)) for a in args],
        out_specs=pl.BlockSpec((B_pad, H), lambda i: (0, 0)),
        compiler_params=pltpu.CompilerParams(dimension_semantics=("arbitrary",)),
    )(*args)
    return out[:B]


def reference_forward(x, p):
    """Pure-JAX (f32) replica of the PyTorch forward (eval mode) for checking."""
    B, Ns, L, Fi = x.shape
    H = p["w1"].shape[0]
    eps = 1e-5

    def bn(h, g, be, rm, rv):
        hf = h.reshape(B, Ns * H)
        hf = (hf - rm) / jnp.sqrt(rv + eps) * g + be
        return hf.reshape(B, Ns, H)

    h = x.reshape(B, Ns, L * Fi) @ p["w1"].T + p["b1"]
    h = jax.nn.relu(bn(h, p["bn1_g"], p["bn1_b"], p["bn1_rm"], p["bn1_rv"]))
    h = h @ p["w2"].T + p["b2"]
    h = jax.nn.relu(bn(h, p["bn2_g"], p["bn2_b"], p["bn2_rm"], p["bn2_rv"]))

    t = jnp.concatenate([jnp.broadcast_to(p["agg"], (B, 1, H)), h], axis=1)  # [B,S,H]
    W3, b3 = p["in_proj_w"], p["in_proj_b"]
    q = t @ W3[0:H].T + b3[0:H]
    k = t @ W3[H:2 * H].T + b3[H:2 * H]
    v = t @ W3[2 * H:].T + b3[2 * H:]
    # batch_first=False -> attention over dim 0 (true batch), per slot (dim 1)
    scores = jnp.einsum("bsh,csh->sbc", q, k) * (1.0 / (H ** 0.5))
    pa = jax.nn.softmax(scores, axis=-1)
    attn = jnp.einsum("sbc,csh->bsh", pa, v)
    attn = attn @ p["out_w"].T + p["out_b"]

    def ln(xx, g, b):
        mu = xx.mean(-1, keepdims=True)
        var = ((xx - mu) ** 2).mean(-1, keepdims=True)
        return (xx - mu) / jnp.sqrt(var + eps) * g + b

    y = ln(t + attn, p["ln1_w"], p["ln1_b"])
    f = jax.nn.relu(y @ p["ff1_w"].T + p["ff1_b"]) @ p["ff2_w"].T + p["ff2_b"]
    z = ln(y + f, p["ln2_w"], p["ln2_b"])
    return z[:, 0, :]


def init_params(key, Fi=1, Ns=8, L=4, H=16, F=64):
    ks = iter(jax.random.split(key, 32))

    def nrm(shape, scale):
        return scale * jax.random.normal(next(ks), shape, jnp.float32)

    Din = Fi * L
    p = {
        "w1": nrm((H, Din), 0.3), "b1": nrm((H,), 0.1),
        "bn1_g": 1.0 + nrm((Ns * H,), 0.1), "bn1_b": nrm((Ns * H,), 0.1),
        "bn1_rm": nrm((Ns * H,), 0.05), "bn1_rv": 1.0 + jnp.abs(nrm((Ns * H,), 0.1)),
        "w2": nrm((H, H), 0.3), "b2": nrm((H,), 0.1),
        "bn2_g": 1.0 + nrm((Ns * H,), 0.1), "bn2_b": nrm((Ns * H,), 0.1),
        "bn2_rm": nrm((Ns * H,), 0.05), "bn2_rv": 1.0 + jnp.abs(nrm((Ns * H,), 0.1)),
        "agg": nrm((1, 1, H), 1.0),
        "in_proj_w": nrm((3 * H, H), 0.3), "in_proj_b": nrm((3 * H,), 0.1),
        "out_w": nrm((H, H), 0.3), "out_b": nrm((H,), 0.1),
        "ff1_w": nrm((F, H), 0.3), "ff1_b": nrm((F,), 0.1),
        "ff2_w": nrm((H, F), 0.3), "ff2_b": nrm((H,), 0.1),
        "ln1_w": 1.0 + nrm((H,), 0.1), "ln1_b": nrm((H,), 0.1),
        "ln2_w": 1.0 + nrm((H,), 0.1), "ln2_b": nrm((H,), 0.1),
    }
    return p


if __name__ == "__main__":
    B, Ns, L, Fi, H, F = 2, 8, 4, 1, 16, 64
    key = jax.random.PRNGKey(0)
    pkey, xkey = jax.random.split(key)
    params = init_params(pkey, Fi=Fi, Ns=Ns, L=L, H=H, F=F)
    x = jax.random.normal(xkey, (B, Ns, L, Fi), jnp.float32)

    out = parking_sensor_encoder_forward(x, params)
    out = jax.block_until_ready(out)

    ref = reference_forward(x, params)
    assert out.shape == (B, H)
    assert bool(jnp.all(jnp.isfinite(out)))
    # kernel uses bf16 matmul operands (f32 accumulation) + approx softmax reciprocal;
    # 3e-2 absorbs that quantization
    assert bool(jnp.allclose(out, ref, rtol=3e-2, atol=3e-2))
    print("KERNEL_OK")
</pallas_src>

<mosaic_0001>
module attributes {stable_mosaic.version = 11 : i64} {
  func.func @kernel(%arg0: i32, %arg1: memref<16x128xbf16, #tpu.memory_space<vmem>>, %arg2: memref<368x128xbf16, #tpu.memory_space<vmem>>, %arg3: memref<136x128xf32, #tpu.memory_space<vmem>>, %arg4: memref<16x16xf32, #tpu.memory_space<vmem>>) attributes {dimension_semantics = [#tpu.dimension_semantics<arbitrary>], iteration_bounds = array<i64: 1>, scalar_prefetch = 0 : i64, scratch_operands = 0 : i64, tpu.core_type = #tpu.core_type<tc>, window_params = [{pipeline_mode = #tpu.pipeline_mode<synchronous>, transform_indices = @transform_0, window_bounds = array<i64: 16, 128>}, {pipeline_mode = #tpu.pipeline_mode<synchronous>, transform_indices = @transform_1, window_bounds = array<i64: 368, 128>}, {pipeline_mode = #tpu.pipeline_mode<synchronous>, transform_indices = @transform_2, window_bounds = array<i64: 136, 128>}, {pipeline_mode = #tpu.pipeline_mode<synchronous>, transform_indices = @transform_3, window_bounds = array<i64: 16, 16>}]} {
    %c0 = arith.constant 0 : index
    %c0_0 = arith.constant 0 : index
    %0 = vector.load %arg1[%c0, %c0_0] : memref<16x128xbf16, #tpu.memory_space<vmem>>, vector<16x128xbf16>
    %c0_1 = arith.constant 0 : index
    %c0_2 = arith.constant 0 : index
    %1 = vector.load %arg2[%c0_1, %c0_2] : memref<368x128xbf16, #tpu.memory_space<vmem>>, vector<128x128xbf16>
    %cst = arith.constant dense<0.000000e+00> : vector<16x128xf32>
    %2 = tpu.matmul %0, %1, %cst {dimension_numbers = #tpu.dot_dimension_numbers<[1], [0], [0], [1], [0, 0, 1, 1], [], []>} : vector<16x128xbf16>, vector<128x128xbf16>, vector<16x128xf32> -> vector<16x128xf32>
    %c0_3 = arith.constant 0 : index
    %c0_4 = arith.constant 0 : index
    %3 = vector.load %arg3[%c0_3, %c0_4] : memref<136x128xf32, #tpu.memory_space<vmem>>, vector<16x128xf32>
    %4 = arith.mulf %2, %3 : vector<16x128xf32>
    %c16 = arith.constant 16 : index
    %c0_5 = arith.constant 0 : index
    %5 = vector.load %arg3[%c16, %c0_5] : memref<136x128xf32, #tpu.memory_space<vmem>>, vector<16x128xf32>
    %6 = arith.addf %4, %5 : vector<16x128xf32>
    %cst_6 = arith.constant 0.000000e+00 : f32
    %7 = vector.broadcast %cst_6 : f32 to vector<16x128xf32>
    %8 = arith.maximumf %6, %7 : vector<16x128xf32>
    %9 = arith.truncf %8 : vector<16x128xf32> to vector<16x128xbf16>
    %c128 = arith.constant 128 : index
    %c0_7 = arith.constant 0 : index
    %10 = vector.load %arg2[%c128, %c0_7] : memref<368x128xbf16, #tpu.memory_space<vmem>>, vector<128x128xbf16>
    %cst_8 = arith.constant dense<0.000000e+00> : vector<16x128xf32>
    %11 = tpu.matmul %9, %10, %cst_8 {dimension_numbers = #tpu.dot_dimension_numbers<[1], [0], [0], [1], [0, 0, 1, 1], [], []>} : vector<16x128xbf16>, vector<128x128xbf16>, vector<16x128xf32> -> vector<16x128xf32>
    %c32 = arith.constant 32 : index
    %c0_9 = arith.constant 0 : index
    %12 = vector.load %arg3[%c32, %c0_9] : memref<136x128xf32, #tpu.memory_space<vmem>>, vector<16x128xf32>
    %13 = arith.mulf %11, %12 : vector<16x128xf32>
    %c48 = arith.constant 48 : index
    %c0_10 = arith.constant 0 : index
    %14 = vector.load %arg3[%c48, %c0_10] : memref<136x128xf32, #tpu.memory_space<vmem>>, vector<16x128xf32>
    %15 = arith.addf %13, %14 : vector<16x128xf32>
    %cst_11 = arith.constant 0.000000e+00 : f32
    %16 = vector.broadcast %cst_11 : f32 to vector<16x128xf32>
    %17 = arith.maximumf %15, %16 : vector<16x128xf32>
    %c64 = arith.constant 64 : index
    %c0_12 = arith.constant 0 : index
    %18 = vector.load %arg3[%c64, %c0_12] : memref<136x128xf32, #tpu.memory_space<vmem>>, vector<1x16xf32>
    %19 = vector.shape_cast %18 : vector<1x16xf32> to vector<1x16xf32>
    %20 = vector.broadcast %19 : vector<1x16xf32> to vector<16x16xf32>
    %21 = vector.extract_strided_slice %17 {offsets = [0, 0], sizes = [16, 16], strides = [1, 1]} : vector<16x128xf32> to vector<16x16xf32>
    %22 = vector.extract_strided_slice %17 {offsets = [0, 16], sizes = [16, 16], strides = [1, 1]} : vector<16x128xf32> to vector<16x16xf32>
    %23 = vector.extract_strided_slice %17 {offsets = [0, 32], sizes = [16, 16], strides = [1, 1]} : vector<16x128xf32> to vector<16x16xf32>
    %24 = vector.extract_strided_slice %17 {offsets = [0, 48], sizes = [16, 16], strides = [1, 1]} : vector<16x128xf32> to vector<16x16xf32>
    %25 = vector.extract_strided_slice %17 {offsets = [0, 64], sizes = [16, 16], strides = [1, 1]} : vector<16x128xf32> to vector<16x16xf32>
    %26 = vector.extract_strided_slice %17 {offsets = [0, 80], sizes = [16, 16], strides = [1, 1]} : vector<16x128xf32> to vector<16x16xf32>
    %27 = vector.extract_strided_slice %17 {offsets = [0, 96], sizes = [16, 16], strides = [1, 1]} : vector<16x128xf32> to vector<16x16xf32>
    %28 = vector.extract_strided_slice %17 {offsets = [0, 112], sizes = [16, 16], strides = [1, 1]} : vector<16x128xf32> to vector<16x16xf32>
    %29 = tpu.concatenate %20, %21, %22, %23, %24, %25, %26, %27, %28 in 0 : vector<16x16xf32>, vector<16x16xf32>, vector<16x16xf32>, vector<16x16xf32>, vector<16x16xf32>, vector<16x16xf32>, vector<16x16xf32>, vector<16x16xf32>, vector<16x16xf32> -> vector<144x16xf32>
    %30 = arith.truncf %29 : vector<144x16xf32> to vector<144x16xbf16>
    %c256 = arith.constant 256 : index
    %c0_13 = arith.constant 0 : index
    %31 = vector.load %arg2[%c256, %c0_13] : memref<368x128xbf16, #tpu.memory_space<vmem>>, vector<16x48xbf16>
    %cst_14 = arith.constant dense<0.000000e+00> : vector<144x48xf32>
    %32 = tpu.matmul %30, %31, %cst_14 {dimension_numbers = #tpu.dot_dimension_numbers<[1], [0], [0], [1], [0, 0, 1, 1], [], []>} : vector<144x16xbf16>, vector<16x48xbf16>, vector<144x48xf32> -> vector<144x48xf32>
    %c72 = arith.constant 72 : index
    %c0_15 = arith.constant 0 : index
    %33 = vector.load %arg3[%c72, %c0_15] : memref<136x128xf32, #tpu.memory_space<vmem>>, vector<1x48xf32>
    %34 = vector.broadcast %33 : vector<1x48xf32> to vector<144x48xf32>
    %35 = arith.addf %32, %34 : vector<144x48xf32>
    %36 = vector.extract_strided_slice %35 {offsets = [0, 0], sizes = [144, 16], strides = [1, 1]} : vector<144x48xf32> to vector<144x16xf32>
    %37 = vector.extract_strided_slice %35 {offsets = [0, 16], sizes = [144, 16], strides = [1, 1]} : vector<144x48xf32> to vector<144x16xf32>
    %38 = vector.extract_strided_slice %35 {offsets = [0, 32], sizes = [144, 16], strides = [1, 1]} : vector<144x48xf32> to vector<144x16xf32>
    %39 = tpu.transpose %37, [1, 0] : vector<144x16xf32> -> vector<16x144xf32>
    %cst_16 = arith.constant dense<0.000000e+00> : vector<144x144xf32>
    %40 = tpu.matmul %36, %39, %cst_16 {dimension_numbers = #tpu.dot_dimension_numbers<[1], [0], [0], [1], [0, 0, 1, 1], [], []>} : vector<144x16xf32>, vector<16x144xf32>, vector<144x144xf32> -> vector<144x144xf32>
    %cst_17 = arith.constant 2.500000e-01 : f32
    %41 = vector.broadcast %cst_17 : f32 to vector<144x144xf32>
    %42 = arith.mulf %40, %41 : vector<144x144xf32>
    %43 = tpu.iota {dimensions = array<i32: 1>} : vector<144x144xi32>
    %c0_i32 = arith.constant 0 : i32
    %44 = vector.broadcast %c0_i32 : i32 to vector<16x1xi32>
    %c16_i32 = arith.constant 16 : i32
    %45 = vector.broadcast %c16_i32 : i32 to vector<16x1xi32>
    %c32_i32 = arith.constant 32 : i32
    %46 = vector.broadcast %c32_i32 : i32 to vector<16x1xi32>
    %c48_i32 = arith.constant 48 : i32
    %47 = vector.broadcast %c48_i32 : i32 to vector<16x1xi32>
    %c64_i32 = arith.constant 64 : i32
    %48 = vector.broadcast %c64_i32 : i32 to vector<16x1xi32>
    %c80_i32 = arith.constant 80 : i32
    %49 = vector.broadcast %c80_i32 : i32 to vector<16x1xi32>
    %c96_i32 = arith.constant 96 : i32
    %50 = vector.broadcast %c96_i32 : i32 to vector<16x1xi32>
    %c112_i32 = arith.constant 112 : i32
    %51 = vector.broadcast %c112_i32 : i32 to vector<16x1xi32>
    %c128_i32 = arith.constant 128 : i32
    %52 = vector.broadcast %c128_i32 : i32 to vector<16x1xi32>
    %53 = tpu.concatenate %44, %45, %46, %47, %48, %49, %50, %51, %52 in 0 : vector<16x1xi32>, vector<16x1xi32>, vector<16x1xi32>, vector<16x1xi32>, vector<16x1xi32>, vector<16x1xi32>, vector<16x1xi32>, vector<16x1xi32>, vector<16x1xi32> -> vector<144x1xi32>
    %54 = vector.broadcast %53 : vector<144x1xi32> to vector<144x144xi32>
    %55 = arith.cmpi sge, %43, %54 : vector<144x144xi32>
    %c2_i32 = arith.constant 2 : i32
    %56 = vector.broadcast %c2_i32 : i32 to vector<144x1xi32>
    %57 = arith.addi %53, %56 : vector<144x1xi32>
    %58 = vector.broadcast %57 : vector<144x1xi32> to vector<144x144xi32>
    %59 = arith.cmpi slt, %43, %58 : vector<144x144xi32>
    %60 = arith.andi %55, %59 : vector<144x144xi1>
    %cst_18 = arith.constant -1.000000e+30 : f32
    %61 = vector.broadcast %cst_18 : f32 to vector<144x144xf32>
    %62 = arith.select %60, %42, %61 : vector<144x144xi1>, vector<144x144xf32>
    %cst_19 = arith.constant dense<0xFF800000> : vector<144xf32>
    %63 = vector.multi_reduction <maximumf>, %62, %cst_19 [1] : vector<144x144xf32> to vector<144xf32>
    %64 = vector.shape_cast %63 : vector<144xf32> to vector<144x1xf32>
    %65 = vector.broadcast %64 : vector<144x1xf32> to vector<144x144xf32>
    %66 = arith.subf %62, %65 : vector<144x144xf32>
    %67 = math.exp %66 : vector<144x144xf32>
    %cst_20 = arith.constant dense<0.000000e+00> : vector<144xf32>
    %68 = vector.multi_reduction <add>, %67, %cst_20 [1] : vector<144x144xf32> to vector<144xf32>
    %69 = vector.shape_cast %68 : vector<144xf32> to vector<144x1xf32>
    %70 = tpu.reciprocal %69 {approx = true} : vector<144x1xf32> -> vector<144x1xf32>
    %71 = vector.broadcast %70 : vector<144x1xf32> to vector<144x144xf32>
    %72 = arith.mulf %67, %71 : vector<144x144xf32>
    %cst_21 = arith.constant dense<0.000000e+00> : vector<144x16xf32>
    %73 = tpu.matmul %72, %38, %cst_21 {dimension_numbers = #tpu.dot_dimension_numbers<[1], [0], [0], [1], [0, 0, 1, 1], [], []>} : vector<144x144xf32>, vector<144x16xf32>, vector<144x16xf32> -> vector<144x16xf32>
    %74 = arith.truncf %73 : vector<144x16xf32> to vector<144x16xbf16>
    %c272 = arith.constant 272 : index
    %c0_22 = arith.constant 0 : index
    %75 = vector.load %arg2[%c272, %c0_22] : memref<368x128xbf16, #tpu.memory_space<vmem>>, vector<16x16xbf16>
    %cst_23 = arith.constant dense<0.000000e+00> : vector<144x16xf32>
    %76 = tpu.matmul %74, %75, %cst_23 {dimension_numbers = #tpu.dot_dimension_numbers<[1], [0], [0], [1], [0, 0, 1, 1], [], []>} : vector<144x16xbf16>, vector<16x16xbf16>, vector<144x16xf32> -> vector<144x16xf32>
    %c80 = arith.constant 80 : index
    %c0_24 = arith.constant 0 : index
    %77 = vector.load %arg3[%c80, %c0_24] : memref<136x128xf32, #tpu.memory_space<vmem>>, vector<1x16xf32>
    %78 = vector.broadcast %77 : vector<1x16xf32> to vector<144x16xf32>
    %79 = arith.addf %76, %78 : vector<144x16xf32>
    %80 = arith.addf %29, %79 : vector<144x16xf32>
    %c88 = arith.constant 88 : index
    %c0_25 = arith.constant 0 : index
    %81 = vector.load %arg3[%c88, %c0_25] : memref<136x128xf32, #tpu.memory_space<vmem>>, vector<1x16xf32>
    %c96 = arith.constant 96 : index
    %c0_26 = arith.constant 0 : index
    %82 = vector.load %arg3[%c96, %c0_26] : memref<136x128xf32, #tpu.memory_space<vmem>>, vector<1x16xf32>
    %cst_27 = arith.constant dense<0.000000e+00> : vector<144xf32>
    %83 = vector.multi_reduction <add>, %80, %cst_27 [1] : vector<144x16xf32> to vector<144xf32>
    %84 = vector.shape_cast %83 : vector<144xf32> to vector<144x1xf32>
    %cst_28 = arith.constant 1.600000e+01 : f32
    %85 = vector.broadcast %cst_28 : f32 to vector<144x1xf32>
    %86 = arith.divf %84, %85 : vector<144x1xf32>
    %87 = vector.broadcast %86 : vector<144x1xf32> to vector<144x16xf32>
    %88 = arith.subf %80, %87 : vector<144x16xf32>
    %89 = arith.mulf %88, %88 : vector<144x16xf32>
    %cst_29 = arith.constant dense<0.000000e+00> : vector<144xf32>
    %90 = vector.multi_reduction <add>, %89, %cst_29 [1] : vector<144x16xf32> to vector<144xf32>
    %91 = vector.shape_cast %90 : vector<144xf32> to vector<144x1xf32>
    %cst_30 = arith.constant 1.600000e+01 : f32
    %92 = vector.broadcast %cst_30 : f32 to vector<144x1xf32>
    %93 = arith.divf %91, %92 : vector<144x1xf32>
    %94 = vector.broadcast %86 : vector<144x1xf32> to vector<144x16xf32>
    %95 = arith.subf %80, %94 : vector<144x16xf32>
    %cst_31 = arith.constant 9.99999974E-6 : f32
    %96 = vector.broadcast %cst_31 : f32 to vector<144x1xf32>
    %97 = arith.addf %93, %96 : vector<144x1xf32>
    %98 = math.rsqrt %97 : vector<144x1xf32>
    %99 = vector.broadcast %98 : vector<144x1xf32> to vector<144x16xf32>
    %100 = arith.mulf %95, %99 : vector<144x16xf32>
    %101 = vector.broadcast %81 : vector<1x16xf32> to vector<144x16xf32>
    %102 = arith.mulf %100, %101 : vector<144x16xf32>
    %103 = vector.broadcast %82 : vector<1x16xf32> to vector<144x16xf32>
    %104 = arith.addf %102, %103 : vector<144x16xf32>
    %105 = arith.truncf %104 : vector<144x16xf32> to vector<144x16xbf16>
    %c288 = arith.constant 288 : index
    %c0_32 = arith.constant 0 : index
    %106 = vector.load %arg2[%c288, %c0_32] : memref<368x128xbf16, #tpu.memory_space<vmem>>, vector<16x64xbf16>
    %cst_33 = arith.constant dense<0.000000e+00> : vector<144x64xf32>
    %107 = tpu.matmul %105, %106, %cst_33 {dimension_numbers = #tpu.dot_dimension_numbers<[1], [0], [0], [1], [0, 0, 1, 1], [], []>} : vector<144x16xbf16>, vector<16x64xbf16>, vector<144x64xf32> -> vector<144x64xf32>
    %c104 = arith.constant 104 : index
    %c0_34 = arith.constant 0 : index
    %108 = vector.load %arg3[%c104, %c0_34] : memref<136x128xf32, #tpu.memory_space<vmem>>, vector<1x64xf32>
    %109 = vector.broadcast %108 : vector<1x64xf32> to vector<144x64xf32>
    %110 = arith.addf %107, %109 : vector<144x64xf32>
    %cst_35 = arith.constant 0.000000e+00 : f32
    %111 = vector.broadcast %cst_35 : f32 to vector<144x64xf32>
    %112 = arith.maximumf %110, %111 : vector<144x64xf32>
    %113 = arith.truncf %112 : vector<144x64xf32> to vector<144x64xbf16>
    %c304 = arith.constant 304 : index
    %c0_36 = arith.constant 0 : index
    %114 = vector.load %arg2[%c304, %c0_36] : memref<368x128xbf16, #tpu.memory_space<vmem>>, vector<64x16xbf16>
    %cst_37 = arith.constant dense<0.000000e+00> : vector<144x16xf32>
    %115 = tpu.matmul %113, %114, %cst_37 {dimension_numbers = #tpu.dot_dimension_numbers<[1], [0], [0], [1], [0, 0, 1, 1], [], []>} : vector<144x64xbf16>, vector<64x16xbf16>, vector<144x16xf32> -> vector<144x16xf32>
    %c112 = arith.constant 112 : index
    %c0_38 = arith.constant 0 : index
    %116 = vector.load %arg3[%c112, %c0_38] : memref<136x128xf32, #tpu.memory_space<vmem>>, vector<1x16xf32>
    %117 = vector.broadcast %116 : vector<1x16xf32> to vector<144x16xf32>
    %118 = arith.addf %115, %117 : vector<144x16xf32>
    %119 = arith.addf %104, %118 : vector<144x16xf32>
    %c120 = arith.constant 120 : index
    %c0_39 = arith.constant 0 : index
    %120 = vector.load %arg3[%c120, %c0_39] : memref<136x128xf32, #tpu.memory_space<vmem>>, vector<1x16xf32>
    %c128_40 = arith.constant 128 : index
    %c0_41 = arith.constant 0 : index
    %121 = vector.load %arg3[%c128_40, %c0_41] : memref<136x128xf32, #tpu.memory_space<vmem>>, vector<1x16xf32>
    %cst_42 = arith.constant dense<0.000000e+00> : vector<144xf32>
    %122 = vector.multi_reduction <add>, %119, %cst_42 [1] : vector<144x16xf32> to vector<144xf32>
    %123 = vector.shape_cast %122 : vector<144xf32> to vector<144x1xf32>
    %cst_43 = arith.constant 1.600000e+01 : f32
    %124 = vector.broadcast %cst_43 : f32 to vector<144x1xf32>
    %125 = arith.divf %123, %124 : vector<144x1xf32>
    %126 = vector.broadcast %125 : vector<144x1xf32> to vector<144x16xf32>
    %127 = arith.subf %119, %126 : vector<144x16xf32>
    %128 = arith.mulf %127, %127 : vector<144x16xf32>
    %cst_44 = arith.constant dense<0.000000e+00> : vector<144xf32>
    %129 = vector.multi_reduction <add>, %128, %cst_44 [1] : vector<144x16xf32> to vector<144xf32>
    %130 = vector.shape_cast %129 : vector<144xf32> to vector<144x1xf32>
    %cst_45 = arith.constant 1.600000e+01 : f32
    %131 = vector.broadcast %cst_45 : f32 to vector<144x1xf32>
    %132 = arith.divf %130, %131 : vector<144x1xf32>
    %133 = vector.broadcast %125 : vector<144x1xf32> to vector<144x16xf32>
    %134 = arith.subf %119, %133 : vector<144x16xf32>
    %cst_46 = arith.constant 9.99999974E-6 : f32
    %135 = vector.broadcast %cst_46 : f32 to vector<144x1xf32>
    %136 = arith.addf %132, %135 : vector<144x1xf32>
    %137 = math.rsqrt %136 : vector<144x1xf32>
    %138 = vector.broadcast %137 : vector<144x1xf32> to vector<144x16xf32>
    %139 = arith.mulf %134, %138 : vector<144x16xf32>
    %140 = vector.broadcast %120 : vector<1x16xf32> to vector<144x16xf32>
    %141 = arith.mulf %139, %140 : vector<144x16xf32>
    %142 = vector.broadcast %121 : vector<1x16xf32> to vector<144x16xf32>
    %143 = arith.addf %141, %142 : vector<144x16xf32>
    %144 = vector.extract_strided_slice %143 {offsets = [0, 0], sizes = [16, 16], strides = [1, 1]} : vector<144x16xf32> to vector<16x16xf32>
    %c0_47 = arith.constant 0 : index
    %c0_48 = arith.constant 0 : index
    %145 = vector.load %arg4[%c0_47, %c0_48] : memref<16x16xf32, #tpu.memory_space<vmem>>, vector<16x16xf32>
    tpu.vector_store %arg4[%c0_47, %c0_48], %144 {strides = array<i32>} : memref<16x16xf32, #tpu.memory_space<vmem>>, vector<16x16xf32>,
    return
  }
  func.func @transform_0(%arg0: i32) -> (i32, i32) {
    %c0_i32 = arith.constant 0 : i32
    %c0_i32_0 = arith.constant 0 : i32
    %c0_i32_1 = arith.constant 0 : i32
    return %c0_i32, %c0_i32_0 : i32, i32
  }
  func.func @transform_1(%arg0: i32) -> (i32, i32) {
    %c0_i32 = arith.constant 0 : i32
    %c0_i32_0 = arith.constant 0 : i32
    %c0_i32_1 = arith.constant 0 : i32
    return %c0_i32, %c0_i32_0 : i32, i32
  }
  func.func @transform_2(%arg0: i32) -> (i32, i32) {
    %c0_i32 = arith.constant 0 : i32
    %c0_i32_0 = arith.constant 0 : i32
    %c0_i32_1 = arith.constant 0 : i32
    return %c0_i32, %c0_i32_0 : i32, i32
  }
  func.func @transform_3(%arg0: i32) -> (i32, i32) {
    %c0_i32 = arith.constant 0 : i32
    %c0_i32_0 = arith.constant 0 : i32
    %c0_i32_1 = arith.constant 0 : i32
    return %c0_i32, %c0_i32_0 : i32, i32
  }
}

</mosaic_0001>

<bundles_post_ra>
// kernel: tpu_custom_call.1
= control target key start
LH: loop header
LB: loop body
LE: loop exit
PB: predicated region body
PF: predicated region fallthrough
CT: control target
= control target key end

     0   :  { %8 = vsyncpa [#allocation3], 0  ;;  %s4353_s0 = inlined_call_operand.hbm [shape: bf16[16,128], index: 0, kind: input, shape index: {}]   ;;  %s4354_s1 = inlined_call_operand.hbm [shape: bf16[368,128], index: 1, kind: input, shape index: {}]   ;;  %s4355_s2 = inlined_call_operand.hbm [shape: f32[136,128], index: 2, kind: input, shape index: {}]   ;;  %s4356_s3 = inlined_call_operand.hbm [shape: f32[16,16], index: 3, kind: output, shape index: {}]  }
   0x1   :  { %9 = vsyncpa [#allocation6], 0 }
   0x2   :  { %10 = vsyncpa [#allocation4], 0  ;;  %s3223_s12 = smov [#allocation5]   ;;  %s3224_s14 = smov [#allocation2]  }
   0x3   :  { %s28_s13 = sshll.u32 %s3223_s12, 4  ;;  %s16_s15 = sshll.u32 %s3224_s14, 4  ;;  %s29_s13 = int_to_ptr.vmem [resolvable:$true] %s28_s13  ;;  %s3262_s15 = int_to_ptr.vmem [resolvable:$true] %s16_s15 }
   0x4   :  { %s3129_s18 = scalar_lea.hbm %s4354_s1, 2944 }
   0x5   :  { %p3130_p0 = scmp.ne.s32.totalorder %s4354_s1, %s3129_s18  ;;  %p3133_p1 = scmp.lt.u32.totalorder %s3129_s18, %s4354_s1 }
   0x7   :  { %p3135_p2 = pnand %p3133_p1, %p3130_p0 }
   0x9   :  { %3138 = shalt.err (!%p3135_p2)
}
   0xa   :  { %s3139_s23 = scalar_lea.vmem %s29_s13, 2944  ;;  %p3144_p4 = scmp.lt.s32.totalorder %s29_s13, %s29_s13 }
   0xb   :  { %p3140_p3 = scmp.ne.s32.totalorder %s29_s13, %s3139_s23  ;;  %p3145_p5 = scmp.lt.s32.totalorder %s3139_s23, %s3139_s23 }
   0xd   :  { %p3146_p6 = por %p3145_p5, %p3144_p4 }
   0xf   :  { %p3147_p7 = pnand %p3146_p6, %p3140_p3 }
  0x11   :  { %3150 = shalt.err (!%p3147_p7)
}
  0x12   :  { %s3225_s24 = smov 64   ;;  %s3226_s25 = smov 4  }
  0x13   :  { %34 = dma.hbm_to_vmem [thread:$0]  %s4354_s1, 2944, %s29_s13, [#allocation6], %s3225_s24, %s3225_s24, %s3226_s25  }
  0x14   :  { %s3151_s30 = scalar_lea.hbm %s4353_s0, 128 }
  0x15   :  { %p3152_p8 = scmp.ne.s32.totalorder %s4353_s0, %s3151_s30  ;;  %p3155_p9 = scmp.lt.u32.totalorder %s3151_s30, %s4353_s0 }
  0x17   :  { %p3157_p10 = pnand %p3155_p9, %p3152_p8 }
  0x19   :  { %3160 = shalt.err (!%p3157_p10)
}
  0x1a   :  { %s3161_s8 = scalar_lea.vmem %s3262_s15, 128  ;;  %p3166_p12 = scmp.lt.s32.totalorder %s3262_s15, %s3262_s15 }
  0x1b   :  { %p3162_p11 = scmp.ne.s32.totalorder %s3262_s15, %s3161_s8  ;;  %p3167_p13 = scmp.lt.s32.totalorder %s3161_s8, %s3161_s8 }
  0x1d   :  { %p3168_p0 = por %p3167_p13, %p3166_p12 }
  0x1f   :  { %p3169_p1 = pnand %p3168_p0, %p3162_p11 }
  0x21   :  { %3172 = shalt.err (!%p3169_p1)
}
  0x22   :  { %22 = dma.hbm_to_vmem [thread:$0]  %s4353_s0, 128, %s3262_s15, [#allocation3], %s3225_s24, %s3225_s24, %s3226_s25  }
  0x23   :  { %s3227_s10 = smov [#allocation7]   ;;  %s3173_s14 = scalar_lea.hbm %s4355_s2, 2176 }
  0x24   :  { %s40_s11 = sshll.u32 %s3227_s10, 4  ;;  %p3174_p2 = scmp.ne.s32.totalorder %s4355_s2, %s3173_s14  ;;  %s41_s11 = int_to_ptr.vmem [resolvable:$true] %s40_s11 }
  0x25   :  { %p3177_p3 = scmp.lt.u32.totalorder %s3173_s14, %s4355_s2 }
  0x27   :  { %p3179_p4 = pnand %p3177_p3, %p3174_p2 }
  0x29   :  { %3182 = shalt.err (!%p3179_p4)
}
  0x2a   :  { %s3183_s20 = scalar_lea.vmem %s41_s11, 2176  ;;  %p3188_p6 = scmp.lt.s32.totalorder %s41_s11, %s41_s11 }
  0x2b   :  { %p3184_p5 = scmp.ne.s32.totalorder %s41_s11, %s3183_s20  ;;  %p3189_p7 = scmp.lt.s32.totalorder %s3183_s20, %s3183_s20 }
  0x2d   :  { %p3190_p8 = por %p3189_p7, %p3188_p6 }
  0x2f   :  { %p3191_p9 = pnand %p3190_p8, %p3184_p5 }
  0x31   :  { %3194 = shalt.err (!%p3191_p9)
}
  0x32   :  { %s3228_s0 = smov 128   ;;  %s3229_s15 = smov 8  }
  0x33   :  { %46 = dma.hbm_to_vmem [thread:$0]  %s4355_s2, 2176, %s41_s11, [#allocation6], %s3228_s0, %s3228_s0, %s3229_s15  }
  0x34   :  { %3217 = dma.done.wait [#allocation3], 128  }
  0x35   :  { %3218 = vsyncadd [#allocation3], 4294967168 }
  0x36   :  { %3219 = dma.done.wait [#allocation6], 5120  }
  0x37   :  { %3220 = vsyncadd [#allocation6], 4294962176  ;;  %v3230_v0 = vmov 0.0   ;;  %vm3231_vm0 = vmmov 0   ;;  %v2956_v1 = vld [vmem:[#allocation5] sm:$0xff]   ;;  %v2957_v2 = vld [vmem:[#allocation5 + $0x8] sm:$0xff]  }
  0x38   :  { %2585 = vmatprep.subr.bf16.mxu0 %v3230_v0  ;;  %2601 = vmatprep.mubr.msk.bf16.mxu0 %vm3231_vm0, %v3230_v0  ;;  %v2958_v3 = vld [vmem:[#allocation5 + $0x10] sm:$0xff]   ;;  %v2959_v4 = vld [vmem:[#allocation5 + $0x18] sm:$0xff]   ;;  %v2960_v5 = vld [vmem:[#allocation5 + $0x20] sm:$0xff]   ;;  %vm367_vm1 = vcmask 130048   ;;  %s3232_s2 = smov 96   ;;  %s3233_s23 = smov 112  }
  0x39   :  { %690 = vmatprep.mubr.f32.mxu1 %v3230_v0  ;;  %2586 = vmatpush3.bf16.msra.mxu0 %v2956_v1  ;;  %v2961_v6 = vld [vmem:[#allocation5 + $0x28] sm:$0xff]   ;;  %v2962_v7 = vld [vmem:[#allocation5 + $0x30] sm:$0xff]   ;;  %v2963_v8 = vld [vmem:[#allocation5 + $0x38] sm:$0xff]   ;;  %s3234_s25 = smov 80   ;;  %s3235_s26 = smov 48  }
  0x3a   :  { %2587 = vmatprep.subr.bf16.mxu0 %v3230_v0  ;;  %v2964_v9 = vld [vmem:[#allocation2] sm:$0xff]   ;;  %v2965_v10 = vld [vmem:[#allocation5 + $0x40] sm:$0xff]   ;;  %v2966_v11 = vld [vmem:[#allocation5 + $0x48] sm:$0xff]   ;;  %s3236_s27 = smov 32   ;;  %s3237_s28 = smov 16  }
  0x3b   :  { %v2967_v12 = vld [vmem:[#allocation5 + $0x50] sm:$0xff]   ;;  %v2968_v13 = vld [vmem:[#allocation5 + $0x58] sm:$0xff]   ;;  %v2969_v14 = vld [vmem:[#allocation5 + $0x60] sm:$0xff]  }
  0x3c   :  { %v2970_v15 = vld [vmem:[#allocation5 + $0x68] sm:$0xff]   ;;  %v2971_v16 = vld [vmem:[#allocation5 + $0x70] sm:$0xff]   ;;  %v2972_v17 = vld [vmem:[#allocation5 + $0x78] sm:$0xff]  }
  0x3d   :  { %2588 = vmatpush3.bf16.msra.mxu0 %v2957_v2  ;;  %v170_v18 = vld [vmem:[#allocation7] sm:$0xff]  ;;  %v174_v20 = vld [vmem:[#allocation7 + $0x10] sm:$0xff]  ;;  %v171_v21 = vld [vmem:[#allocation7 + $0x8] sm:$0xff] }
  0x3e   :  { %2589 = vmatprep.subr.bf16.mxu0 %v3230_v0  ;;  %v175_v25 = vld [vmem:[#allocation7 + $0x18] sm:$0xff]  ;;  %v2973_v33 = vld [vmem:[#allocation5 + $0x80] sm:$0xff]   ;;  %v2418_v34 = vld [vmem:[#allocation7 + $0x40] ss:$0 sm:$0xff] }
  0x3f   :  { %v345_v35 = vpack.c.bf16 %v2418_v34, %v2418_v34  ;;  %v286_v36 = vld [vmem:[#allocation7 + $0x20] sm:$0xff]  ;;  %v290_v38 = vld [vmem:[#allocation7 + $0x30] sm:$0xff]  ;;  %v287_v39 = vld [vmem:[#allocation7 + $0x28] sm:$0xff] }
  0x40   :  { %v291_v43 = vld [vmem:[#allocation7 + $0x38] sm:$0xff]  ;;  %v3368_v51 = vld [vmem:[#allocation7 + $0x48] ss:$0 sm:$0xff]  ;;  %vm3446_vm2 = vmpackc.low %vm367_vm1, %vm367_vm1 }
  0x41   :  { %2590 = vmatpush3.bf16.msra.mxu0 %v2958_v3 }
  0x42   :  { %2591 = vmatprep.subr.bf16.mxu0 %v3230_v0 }
  0x45   :  { %2592 = vmatpush3.bf16.msra.mxu0 %v2959_v4 }
  0x46   :  { %2593 = vmatprep.subr.bf16.mxu0 %v3230_v0 }
  0x49   :  { %2594 = vmatpush3.bf16.msra.mxu0 %v2960_v5 }
  0x4a   :  { %2595 = vmatprep.subr.bf16.mxu0 %v3230_v0 }
  0x4d   :  { %2596 = vmatpush3.bf16.msra.mxu0 %v2961_v6 }
  0x4e   :  { %2597 = vmatprep.subr.bf16.mxu0 %v3230_v0 }
  0x51   :  { %2598 = vmatpush3.bf16.msra.mxu0 %v2962_v7 }
  0x52   :  { %2599 = vmatprep.subr.bf16.mxu0 %v3230_v0 }
  0x55   :  { %2600 = vmatpush3.bf16.msra.mxu0 %v2963_v8 }
  0x56   :  { %2605 = vmatprep.subr.bf16.mxu0 %v3230_v0 }
  0x58   :  { %2602 = vmatmul.mubr.bf16.vlgmr.msra.gmra.mrb[0].mxu0 %v2964_v9 }
  0x59   :  { %2606 = vmatpush3.bf16.msra.mxu0 %v2965_v10  ;;  %2621 = vmatprep.mubr.msk.bf16.mxu0 %vm3231_vm0, %v3230_v0 }
  0x5a   :  { %2607 = vmatprep.subr.bf16.mxu0 %v3230_v0 }
  0x5d   :  { %2608 = vmatpush3.bf16.msra.mxu0 %v2966_v11 }
  0x5e   :  { %2609 = vmatprep.subr.bf16.mxu0 %v3230_v0 }
  0x61   :  { %2610 = vmatpush3.bf16.msra.mxu0 %v2967_v12 }
  0x62   :  { %2611 = vmatprep.subr.bf16.mxu0 %v3230_v0 }
  0x65   :  { %2612 = vmatpush3.bf16.msra.mxu0 %v2968_v13 }
  0x66   :  { %2613 = vmatprep.subr.bf16.mxu0 %v3230_v0 }
  0x69   :  { %2614 = vmatpush3.bf16.msra.mxu0 %v2969_v14 }
  0x6a   :  { %2615 = vmatprep.subr.bf16.mxu0 %v3230_v0 }
  0x6d   :  { %2616 = vmatpush3.bf16.msra.mxu0 %v2970_v15 }
  0x6e   :  { %2617 = vmatprep.subr.bf16.mxu0 %v3230_v0 }
  0x71   :  { %2618 = vmatpush3.bf16.msra.mxu0 %v2971_v16 }
  0x72   :  { %2619 = vmatprep.subr.bf16.mxu0 %v3230_v0 }
  0x75   :  { %2620 = vmatpush3.bf16.msra.mxu0 %v2972_v17 }
  0x76   :  { %2625 = vmatprep.subr.bf16.mxu0 %v3230_v0 }
 0x12b   :  { %v163_v19 = vpop.f32.mrb[0].mxu0 }
 0x12c   :  { %v172_v22 = vmul.f32 %v170_v18, %v163_v19  ;;  %v2603_v23 = vpop.f32.mrb[1].mxu0 }
 0x12d   :  { %v166_v24 = vpop.f32.mrb[2].mxu0 }
 0x12e   :  { %v176_v26 = vadd.f32 %v174_v20, %v172_v22  ;;  %v173_v27 = vmul.f32 %v171_v21, %v166_v24  ;;  %v2604_v28 = vpop.f32.mrb[3].mxu0  ;;  %v3238_v21 = vmov 0.0|0.0  }
 0x12f   :  { %2783 = vmatprep.subr.bf16.mxu1 %v3238_v21 }
 0x130   :  { %v177_v29 = vadd.f32 %v175_v25, %v173_v27  ;;  %v178_v30 = vmax.f32 %v176_v26, 0.0 }
 0x132   :  { %v179_v31 = vmax.f32 %v177_v29, 0.0 }
 0x134   :  { %v180_v32 = vpack.c.bf16 %v179_v31, %v178_v30 }
 0x136   :  { %2622 = vmatmul.mubr.bf16.vlgmr.msra.gmra.mrb[4].mxu0 %v180_v32 }
 0x137   :  { %2627 = vmatprep.mubr.msk.bf16.mxu0 %vm3231_vm0, %v3230_v0  ;;  %2626 = vmatpush3.bf16.msra.mxu0 %v2973_v33 }
 0x138   :  { %2819 = vmatprep.subr.bf16.mxu0 %v3238_v21 }
 0x13e   :  { %2628 = vmatmul.mubr.msk.bf16.vlgmr.msra.gmra.mrb[8].mxu0 %vm367_vm1, %v345_v35 }
 0x13f   :  { %2631 = vmatprep.mubr.msk.bf16.mxu0 %vm3231_vm0, %v3230_v0 }
 0x209   :  { %v279_v37 = vpop.f32.mrb[4].mxu0 }
 0x20a   :  { %v288_v40 = vmul.f32 %v286_v36, %v279_v37  ;;  %v2623_v41 = vpop.f32.mrb[5].mxu0 }
 0x20b   :  { %v282_v42 = vpop.f32.mrb[6].mxu0 }
 0x20c   :  { %v292_v44 = vadd.f32 %v290_v38, %v288_v40  ;;  %v289_v45 = vmul.f32 %v287_v39, %v282_v42  ;;  %v2624_v46 = vpop.f32.mrb[7].mxu0 }
 0x20e   :  { %v3339_v47 = vmax.f32 %v292_v44, 0.0  ;;  %v293_v48 = vadd.f32 %v291_v43, %v289_v45 }
 0x210   :  { %v3341_v49 = vmax.f32 %v293_v48, 0.0  ;;  %309 = vrot.lane.b32.xlu1 %v3339_v47, %s3232_s2  ;;  %303 = vrot.lane.b32.xlu0 %v3339_v47, %s3233_s23 }
 0x211   :  { %v429_v52 = vpop.f32.mrb[8].mxu0 }
 0x212   :  { %v346_v50 = vpack.c.bf16 %v3341_v49, %v3339_v47  ;;  %v3371_v53 = vadd.f32 %v3368_v51, %v429_v52  ;;  %v2629_v54 = vpop.f32.mrb[9].mxu0 }
 0x213   :  { %v432_v55 = vpop.f32.mrb[10].mxu0 }
 0x214   :  { %311 = vrot.lane.b32.xlu1 %v3341_v49, %s3232_s2  ;;  %305 = vrot.lane.b32.xlu0 %v3341_v49, %s3233_s23  ;;  %v3374_v56 = vadd.f32 %v3368_v51, %v432_v55  ;;  %v2630_v57 = vpop.f32.mrb[11].mxu0 }
 0x215   :  { %2632 = vmatmul.mubr.msk.bf16.gmra.mrb[12].mxu0 %vm367_vm1, %v346_v50 }
 0x216   :  { %2635 = vmatprep.mubr.msk.bf16.mxu0 %vm3231_vm0, %v3230_v0  ;;  %v3378_v58 = vpack.i.bf16 %v3374_v56, %v3371_v53 }
 0x218   :  { %317 = vrot.lane.b32.xlu1 %v3341_v49, %s3234_s25  ;;  %315 = vrot.lane.b32.xlu0 %v3339_v47, %s3234_s25 }
 0x21c   :  { %323 = vrot.lane.b32.xlu1 %v3341_v49, %s3225_s24  ;;  %321 = vrot.lane.b32.xlu0 %v3339_v47, %s3225_s24  ;;  %s3241_s24 = smov [#allocation8]  }
 0x21d   :  { %s2388_s29 = sshll.u32 %s3241_s24, 4  ;;  %s2389_s29 = int_to_ptr.vmem [resolvable:$true] %s2388_s29 }
 0x21e   :  { %s3195_s30 = scalar_lea.vmem %s2389_s29, 256  ;;  %p3200_p11 = scmp.lt.s32.totalorder %s2389_s29, %s2389_s29 }
 0x21f   :  { %p3196_p10 = scmp.ne.s32.totalorder %s2389_s29, %s3195_s30  ;;  %p3201_p12 = scmp.lt.s32.totalorder %s3195_s30, %s3195_s30 }
 0x220   :  { %329 = vrot.lane.b32.xlu1 %v3341_v49, %s3235_s26  ;;  %327 = vrot.lane.b32.xlu0 %v3339_v47, %s3235_s26 }
 0x221   :  { %p3202_p13 = por %p3201_p12, %p3200_p11 }
 0x223   :  { %p3203_p0 = pnand %p3202_p13, %p3196_p10 }
 0x224   :  { %335 = vrot.lane.b32.xlu1 %v3341_v49, %s3236_s27  ;;  %333 = vrot.lane.b32.xlu0 %v3339_v47, %s3236_s27 }
 0x228   :  { %341 = vrot.lane.b32.xlu1 %v3341_v49, %s3237_s28  ;;  %339 = vrot.lane.b32.xlu0 %v3339_v47, %s3237_s28 }
 0x22c   :  { %2866 = vrot.lane.b32.xlu0 %v3378_v58, %s3233_s23 }
 0x282   :  { %v3382_v59 = vpop.permute.xlu0 %303  ;;  %v3384_v60 = vpop.permute.xlu1 %309 }
 0x286   :  { %v3386_v61 = vpop.permute.xlu0 %305  ;;  %v3393_v63 = vpop.permute.xlu1 %311 }
 0x287   :  { %v347_v62 = vpack.c.bf16 %v3386_v61, %v3382_v59  ;;  %v348_v1 = vpack.c.bf16 %v3393_v63, %v3384_v60 }
 0x289   :  { %2636 = vmatmul.mubr.msk.bf16.gmra.mrb[16].mxu0 %vm367_vm1, %v347_v62 }
 0x28a   :  { %2639 = vmatprep.mubr.msk.bf16.mxu0 %vm3231_vm0, %v3230_v0  ;;  %v3400_v2 = vpop.permute.xlu1 %317  ;;  %v3402_v3 = vpop.permute.xlu0 %315 }
 0x28b   :  { %v349_v4 = vpack.c.bf16 %v3400_v2, %v3402_v3 }
 0x28e   :  { %v3409_v5 = vpop.permute.xlu1 %323  ;;  %v3411_v6 = vpop.permute.xlu0 %321 }
 0x28f   :  { %v350_v7 = vpack.c.bf16 %v3409_v5, %v3411_v6 }
 0x291   :  { %2640 = vmatmul.mubr.msk.bf16.gmra.mrb[20].mxu0 %vm367_vm1, %v348_v1 }
 0x292   :  { %2643 = vmatprep.mubr.msk.bf16.mxu0 %vm3231_vm0, %v3230_v0  ;;  %v3418_v8 = vpop.permute.xlu1 %329  ;;  %v3420_v9 = vpop.permute.xlu0 %327 }
 0x293   :  { %v351_v10 = vpack.c.bf16 %v3418_v8, %v3420_v9 }
 0x296   :  { %v3427_v11 = vpop.permute.xlu1 %335  ;;  %v3429_v12 = vpop.permute.xlu0 %333 }
 0x297   :  { %v352_v13 = vpack.c.bf16 %v3427_v11, %v3429_v12 }
 0x299   :  { %2644 = vmatmul.mubr.msk.bf16.gmra.mrb[24].mxu0 %vm367_vm1, %v349_v4 }
 0x29a   :  { %2647 = vmatprep.mubr.msk.bf16.mxu0 %vm3231_vm0, %v3230_v0  ;;  %v3436_v14 = vpop.permute.xlu1 %341  ;;  %v3438_v15 = vpop.permute.xlu0 %339 }
 0x29b   :  { %v353_v16 = vpack.c.bf16 %v3436_v14, %v3438_v15 }
 0x29e   :  { %v2867_v17 = vpop.permute.xlu0 %2866 }
 0x29f   :  { %v2869_v18 = vunpack.i.h.bf16 %v2867_v17  ;;  %v2868_v19 = vunpack.i.l.bf16 %v2867_v17 }
 0x2a1   :  { %2648 = vmatmul.mubr.msk.bf16.gmra.mrb[28].mxu0 %vm367_vm1, %v350_v7  ;;  %v2784_v20 = vpack.c.bf16 %v2869_v18, %v2868_v19 }
 0x2a2   :  { %2651 = vmatprep.mubr.msk.bf16.mxu0 %vm3231_vm0, %v3230_v0 }
 0x2a3   :  { %2786 = vmatpush1.bf16.xpose.msk.msra.mxu1 %vm3446_vm2, %v2784_v20 }
 0x2a4   :  { %2787 = vmatprep.subr.bf16.mxu1 %v3238_v21 }
 0x2a9   :  { %2652 = vmatmul.mubr.msk.bf16.gmra.mrb[32].mxu0 %vm367_vm1, %v351_v10 }
 0x2aa   :  { %2655 = vmatprep.mubr.msk.bf16.mxu0 %vm3231_vm0, %v3230_v0 }
 0x2b1   :  { %2656 = vmatmul.mubr.msk.bf16.gmra.mrb[36].mxu0 %vm367_vm1, %v352_v13 }
 0x2b2   :  { %2659 = vmatprep.mubr.msk.bf16.mxu0 %vm3231_vm0, %v3230_v0 }
 0x2b9   :  { %2660 = vmatmul.mubr.msk.bf16.gmra.mrb[40].mxu0 %vm367_vm1, %v353_v16 }
 0x2e8   :  { %v437_v23 = vpop.f32.mrb[12].mxu0 }
 0x2e9   :  { %v2633_v24 = vpop.f32.mrb[13].mxu0  ;;  %v3455_v26 = vadd.f32 %v3368_v51, %v437_v23 }
 0x2ea   :  { %v440_v25 = vpop.f32.mrb[14].mxu0 }
 0x2eb   :  { %v3458_v27 = vadd.f32 %v3368_v51, %v440_v25  ;;  %v2634_v28 = vpop.f32.mrb[15].mxu0 }
 0x2ed   :  { %v3462_v29 = vpack.i.bf16 %v3458_v27, %v3455_v26 }
 0x2ef   :  { %2871 = vrot.lane.b32.xlu1 %v3462_v29, %s3233_s23 }
 0x35c   :  { %v445_v30 = vpop.f32.mrb[16].mxu0 }
 0x35d   :  { %v2637_v31 = vpop.f32.mrb[17].mxu0  ;;  %v3467_v33 = vadd.f32 %v3368_v51, %v445_v30 }
 0x35e   :  { %v448_v32 = vpop.f32.mrb[18].mxu0 }
 0x35f   :  { %v3470_v34 = vadd.f32 %v3368_v51, %v448_v32  ;;  %v2638_v35 = vpop.f32.mrb[19].mxu0 }
 0x361   :  { %v2872_v36 = vpop.permute.xlu1 %2871  ;;  %v3474_v37 = vpack.i.bf16 %v3470_v34, %v3467_v33 }
 0x362   :  { %v2874_v38 = vunpack.i.h.bf16 %v2872_v36  ;;  %v2873_v39 = vunpack.i.l.bf16 %v2872_v36 }
 0x363   :  { %2876 = vrot.lane.b32.xlu0 %v3474_v37, %s3233_s23 }
 0x364   :  { %v2788_v40 = vpack.c.bf16 %v2874_v38, %v2873_v39  ;;  %v453_v41 = vpop.f32.mrb[20].mxu0 }
 0x365   :  { %v2641_v42 = vpop.f32.mrb[21].mxu0  ;;  %v3481_v44 = vadd.f32 %v3368_v51, %v453_v41 }
 0x366   :  { %2790 = vmatpush1.bf16.xpose.msk.msra.mxu1 %vm3446_vm2, %v2788_v40  ;;  %v456_v43 = vpop.f32.mrb[22].mxu0 }
 0x367   :  { %v3484_v45 = vadd.f32 %v3368_v51, %v456_v43  ;;  %v2642_v46 = vpop.f32.mrb[23].mxu0  ;;  %2791 = vmatprep.subr.bf16.mxu1 %v3238_v21 }
 0x369   :  { %v3489_v48 = vpack.i.bf16 %v3484_v45, %v3481_v44 }
 0x36b   :  { %2881 = vrot.lane.b32.xlu1 %v3489_v48, %s3233_s23 }
 0x36c   :  { %v461_v50 = vpop.f32.mrb[24].mxu0 }
 0x36d   :  { %v2645_v52 = vpop.f32.mrb[25].mxu0  ;;  %v3494_v55 = vadd.f32 %v3368_v51, %v461_v50 }
 0x36e   :  { %v464_v54 = vpop.f32.mrb[26].mxu0 }
 0x36f   :  { %v3497_v57 = vadd.f32 %v3368_v51, %v464_v54  ;;  %v2646_v62 = vpop.f32.mrb[27].mxu0 }
 0x371   :  { %v3501_v1 = vpack.i.bf16 %v3497_v57, %v3494_v55 }
 0x373   :  { %2886 = vrot.lane.b32.xlu0 %v3501_v1, %s3233_s23 }
 0x374   :  { %v469_v4 = vpop.f32.mrb[28].mxu0 }
 0x375   :  { %v2649_v7 = vpop.f32.mrb[29].mxu0  ;;  %v3506_v13 = vadd.f32 %v3368_v51, %v469_v4 }
 0x376   :  { %v472_v10 = vpop.f32.mrb[30].mxu0 }
 0x377   :  { %v3509_v16 = vadd.f32 %v3368_v51, %v472_v10  ;;  %v2650_v17 = vpop.f32.mrb[31].mxu0 }
 0x379   :  { %v3513_v18 = vpack.i.bf16 %v3509_v16, %v3506_v13 }
 0x37b   :  { %2891 = vrot.lane.b32.xlu1 %v3513_v18, %s3233_s23 }
 0x37c   :  { %v477_v19 = vpop.f32.mrb[32].mxu0 }
 0x37d   :  { %v2653_v20 = vpop.f32.mrb[33].mxu0  ;;  %v3518_v24 = vadd.f32 %v3368_v51, %v477_v19 }
 0x37e   :  { %v480_v23 = vpop.f32.mrb[34].mxu0 }
 0x37f   :  { %v3521_v25 = vadd.f32 %v3368_v51, %v480_v23  ;;  %v2654_v28 = vpop.f32.mrb[35].mxu0 }
 0x381   :  { %v3525_v30 = vpack.i.bf16 %v3521_v25, %v3518_v24 }
 0x383   :  { %2896 = vrot.lane.b32.xlu0 %v3525_v30, %s3233_s23 }
 0x384   :  { %v485_v31 = vpop.f32.mrb[36].mxu0 }
 0x385   :  { %v2657_v32 = vpop.f32.mrb[37].mxu0  ;;  %v3530_v36 = vadd.f32 %v3368_v51, %v485_v31 }
 0x386   :  { %v488_v35 = vpop.f32.mrb[38].mxu0 }
 0x387   :  { %v3533_v38 = vadd.f32 %v3368_v51, %v488_v35  ;;  %v2658_v39 = vpop.f32.mrb[39].mxu0 }
 0x389   :  { %v3537_v40 = vpack.i.bf16 %v3533_v38, %v3530_v36 }
 0x38b   :  { %2901 = vrot.lane.b32.xlu1 %v3537_v40, %s3233_s23 }
 0x38c   :  { %v493_v41 = vpop.f32.mrb[40].mxu0 }
 0x38d   :  { %v2661_v42 = vpop.f32.mrb[41].mxu0  ;;  %v3542_v46 = vadd.f32 %v3368_v51, %v493_v41 }
 0x38e   :  { %v496_v43 = vpop.f32.mrb[42].mxu0 }
 0x38f   :  { %v3545_v50 = vadd.f32 %v3368_v51, %v496_v43  ;;  %v2662_v52 = vpop.f32.mrb[43].mxu0 }
 0x391   :  { %v3549_v54 = vpack.i.bf16 %v3545_v50, %v3542_v46 }
 0x393   :  { %2906 = vrot.lane.b32.xlu0 %v3549_v54, %s3233_s23 }
 0x3d5   :  { %v2877_v62 = vpop.permute.xlu0 %2876 }
 0x3d6   :  { %v2879_v4 = vunpack.i.h.bf16 %v2877_v62  ;;  %v2878_v7 = vunpack.i.l.bf16 %v2877_v62 }
 0x3d8   :  { %v2792_v10 = vpack.c.bf16 %v2879_v4, %v2878_v7 }
 0x3da   :  { %2794 = vmatpush1.bf16.xpose.msk.msra.mxu1 %vm3446_vm2, %v2792_v10 }
 0x3db   :  { %2795 = vmatprep.subr.bf16.mxu1 %v3238_v21 }
 0x3dd   :  { %v2882_v17 = vpop.permute.xlu1 %2881 }
 0x3de   :  { %v2884_v51 = vunpack.i.h.bf16 %v2882_v17  ;;  %v2883_v19 = vunpack.i.l.bf16 %v2882_v17 }
 0x3e0   :  { %v2796_v20 = vpack.c.bf16 %v2884_v51, %v2883_v19 }
 0x3e2   :  { %2798 = vmatpush1.bf16.xpose.msk.msra.mxu1 %vm3446_vm2, %v2796_v20 }
 0x3e3   :  { %2799 = vmatprep.subr.bf16.mxu1 %v3238_v21 }
 0x3e5   :  { %v2887_v23 = vpop.permute.xlu0 %2886 }
 0x3e6   :  { %v2889_v28 = vunpack.i.h.bf16 %v2887_v23  ;;  %v2888_v31 = vunpack.i.l.bf16 %v2887_v23 }
 0x3e8   :  { %v2800_v32 = vpack.c.bf16 %v2889_v28, %v2888_v31 }
 0x3ea   :  { %2802 = vmatpush1.bf16.xpose.msk.msra.mxu1 %vm3446_vm2, %v2800_v32 }
 0x3eb   :  { %2803 = vmatprep.subr.bf16.mxu1 %v3238_v21 }
 0x3ed   :  { %v2892_v35 = vpop.permute.xlu1 %2891 }
 0x3ee   :  { %v2894_v39 = vunpack.i.h.bf16 %v2892_v35  ;;  %v2893_v41 = vunpack.i.l.bf16 %v2892_v35 }
 0x3f0   :  { %v2804_v42 = vpack.c.bf16 %v2894_v39, %v2893_v41 }
 0x3f2   :  { %2806 = vmatpush1.bf16.xpose.msk.msra.mxu1 %vm3446_vm2, %v2804_v42 }
 0x3f3   :  { %2807 = vmatprep.subr.bf16.mxu1 %v3238_v21 }
 0x3f5   :  { %v2897_v43 = vpop.permute.xlu0 %2896 }
 0x3f6   :  { %v2899_v52 = vunpack.i.h.bf16 %v2897_v43  ;;  %v2898_v62 = vunpack.i.l.bf16 %v2897_v43 }
 0x3f8   :  { %v2808_v4 = vpack.c.bf16 %v2899_v52, %v2898_v62 }
 0x3fa   :  { %2810 = vmatpush1.bf16.xpose.msk.msra.mxu1 %vm3446_vm2, %v2808_v4 }
 0x3fb   :  { %2811 = vmatprep.subr.bf16.mxu1 %v3238_v21 }
 0x3fd   :  { %v2902_v7 = vpop.permute.xlu1 %2901 }
 0x3fe   :  { %v2904_v10 = vunpack.i.h.bf16 %v2902_v7  ;;  %v2903_v17 = vunpack.i.l.bf16 %v2902_v7 }
 0x400   :  { %v2812_v51 = vpack.c.bf16 %v2904_v10, %v2903_v17 }
 0x402   :  { %2814 = vmatpush1.bf16.xpose.msk.msra.mxu1 %vm3446_vm2, %v2812_v51 }
 0x403   :  { %2815 = vmatprep.subr.bf16.mxu1 %v3238_v21 }
 0x405   :  { %v2907_v19 = vpop.permute.xlu0 %2906 }
 0x406   :  { %v2909_v20 = vunpack.i.h.bf16 %v2907_v19  ;;  %v2908_v23 = vunpack.i.l.bf16 %v2907_v19 }
 0x408   :  { %v2816_v28 = vpack.c.bf16 %v2909_v20, %v2908_v23 }
 0x40a   :  { %2818 = vmatpush1.bf16.xpose.msk.msra.mxu1 %vm3446_vm2, %v2816_v28 }
 0x40b   :  { %2663 = vmatprep.subr.bf16.mxu1 %v3230_v0 }
 0x411   :  { %2448 = vmatmul.mubr.msk.f32.vlgmr.msra.gmra.mrb[0].mxu1 %vm367_vm1, %v3371_v53  ;;  %v835_v53 = vlaneseq }
 0x412   :  { %696 = vmatprep.mubr.f32.mxu1 %v3230_v0 }
 0x415   :  { %2449 = vmatmul.mubr.msk.f32.gmra.mrb[2].mxu1 %vm367_vm1, %v3374_v56  ;;  %v3629_v56 = vand.u32 127, %v835_v53 }
 0x416   :  { %702 = vmatprep.mubr.f32.mxu1 %v3230_v0 }
 0x417   :  { %vm910_vm3 = vcmp.lt.s32.totalorder %v3629_v56, 2  ;;  %vm867_vm4 = vcmp.ge.s32.totalorder %v3629_v56, 16  ;;  %vm912_vm5 = vcmp.lt.s32.totalorder %v3629_v56, 18  ;;  %vm869_vm7 = vcmp.ge.s32.totalorder %v3629_v56, 32 }
 0x418   :  { %vm930_vm6 = vmand %vm867_vm4, %vm912_vm5  ;;  %vm914_vm8 = vcmp.lt.s32.totalorder %v3629_v56, 34  ;;  %vm871_vm10 = vcmp.ge.s32.totalorder %v3629_v56, 48  ;;  %vm916_vm11 = vcmp.lt.s32.totalorder %v3629_v56, 50  ;;  %vm873_vm13 = vcmp.ge.s32.totalorder %v3629_v56, 64 }
 0x419   :  { %2450 = vmatmul.mubr.msk.f32.gmra.mrb[4].mxu1 %vm367_vm1, %v3455_v26  ;;  %vm932_vm9 = vmand %vm869_vm7, %vm914_vm8  ;;  %vm918_vm14 = vcmp.lt.s32.totalorder %v3629_v56, 66  ;;  %vm875_vm2 = vcmp.ge.s32.totalorder %v3629_v56, 80  ;;  %vm877_vm5 = vcmp.ge.s32.totalorder %v3629_v56, 96  ;;  %vm879_vm8 = vcmp.ge.s32.totalorder %v3629_v56, 112 }
 0x41a   :  { %708 = vmatprep.mubr.f32.mxu1 %v3230_v0  ;;  %vm934_vm12 = vmand %vm871_vm10, %vm916_vm11 }
 0x41b   :  { %vm936_vm15 = vmand %vm873_vm13, %vm918_vm14 }
 0x41d   :  { %2451 = vmatmul.mubr.msk.f32.gmra.mrb[6].mxu1 %vm367_vm1, %v3458_v27 }
 0x41e   :  { %714 = vmatprep.mubr.f32.mxu1 %v3230_v0 }
 0x421   :  { %2452 = vmatmul.mubr.msk.f32.gmra.mrb[8].mxu1 %vm367_vm1, %v3467_v33  ;;  %v3239_v33 = vmov -inf  }
 0x422   :  { %720 = vmatprep.mubr.f32.mxu1 %v3230_v0 }
 0x425   :  { %2453 = vmatmul.mubr.msk.f32.gmra.mrb[10].mxu1 %vm367_vm1, %v3470_v34  ;;  %v3633_v34 = vsel %vm367_vm1, -1e+30, %v3239_v33 }
 0x426   :  { %726 = vmatprep.mubr.f32.mxu1 %v3230_v0 }
 0x429   :  { %2454 = vmatmul.mubr.msk.f32.gmra.mrb[12].mxu1 %vm367_vm1, %v3481_v44 }
 0x42a   :  { %732 = vmatprep.mubr.f32.mxu1 %v3230_v0 }
 0x42d   :  { %2455 = vmatmul.mubr.msk.f32.gmra.mrb[14].mxu1 %vm367_vm1, %v3484_v45 }
 0x42e   :  { %738 = vmatprep.mubr.f32.mxu1 %v3230_v0 }
 0x431   :  { %2456 = vmatmul.mubr.msk.f32.gmra.mrb[16].mxu1 %vm367_vm1, %v3494_v55 }
 0x432   :  { %744 = vmatprep.mubr.f32.mxu1 %v3230_v0 }
 0x435   :  { %2457 = vmatmul.mubr.msk.f32.gmra.mrb[18].mxu1 %vm367_vm1, %v3497_v57 }
 0x436   :  { %750 = vmatprep.mubr.f32.mxu1 %v3230_v0 }
 0x439   :  { %2458 = vmatmul.mubr.msk.f32.gmra.mrb[20].mxu1 %vm367_vm1, %v3506_v13 }
 0x43a   :  { %756 = vmatprep.mubr.f32.mxu1 %v3230_v0 }
 0x43d   :  { %2459 = vmatmul.mubr.msk.f32.gmra.mrb[22].mxu1 %vm367_vm1, %v3509_v16 }
 0x43e   :  { %762 = vmatprep.mubr.f32.mxu1 %v3230_v0 }
 0x441   :  { %2460 = vmatmul.mubr.msk.f32.gmra.mrb[24].mxu1 %vm367_vm1, %v3518_v24 }
 0x442   :  { %768 = vmatprep.mubr.f32.mxu1 %v3230_v0 }
 0x445   :  { %2461 = vmatmul.mubr.msk.f32.gmra.mrb[26].mxu1 %vm367_vm1, %v3521_v25 }
 0x446   :  { %774 = vmatprep.mubr.f32.mxu1 %v3230_v0 }
 0x449   :  { %2462 = vmatmul.mubr.msk.f32.gmra.mrb[28].mxu1 %vm367_vm1, %v3530_v36 }
 0x44a   :  { %780 = vmatprep.mubr.f32.mxu1 %v3230_v0 }
 0x44d   :  { %2463 = vmatmul.mubr.msk.f32.gmra.mrb[30].mxu1 %vm367_vm1, %v3533_v38 }
 0x44e   :  { %786 = vmatprep.mubr.f32.mxu1 %v3230_v0 }
 0x451   :  { %2464 = vmatmul.mubr.msk.f32.gmra.mrb[32].mxu1 %vm367_vm1, %v3542_v46 }
 0x452   :  { %792 = vmatprep.mubr.f32.mxu1 %v3230_v0 }
 0x455   :  { %2465 = vmatmul.mubr.msk.f32.gmra.mrb[34].mxu1 %vm367_vm1, %v3545_v50 }
 0x456   :  { %2665 = vmatprep.mubr.msk.bf16.mxu1 %vm3231_vm0, %v3230_v0 }
 0x4e4   :  { %v692_v22 = vpop.f32.mrb[0].mxu1 }
 0x4e5   :  { %v799_v26 = vmul.f32 0.25, %v692_v22  ;;  %v694_v27 = vpop.f32.mrb[1].mxu1 }
 0x4e7   :  { %v3635_v44 = vsel %vm910_vm3, %v799_v26, -1e+30 }
 0x4e8   :  { %v698_v45 = vpop.f32.mrb[2].mxu1  ;;  %v983_v55 = vmax.f32 %v3635_v44, %v3633_v34 }
 0x4e9   :  { %v801_v57 = vmul.f32 0.25, %v698_v45  ;;  %v700_v13 = vpop.f32.mrb[3].mxu1 }
 0x4ea   :  { %984 = vmax.xlane.f32.xlu1 %v983_v55 }
 0x4eb   :  { %v3641_v16 = vsel %vm910_vm3, %v801_v57, -1e+30  ;;  %vm920_vm3 = vcmp.lt.s32.totalorder %v3629_v56, 82 }
 0x4ec   :  { %v704_v24 = vpop.f32.mrb[4].mxu1  ;;  %v987_v25 = vmax.f32 %v3641_v16, %v3633_v34  ;;  %vm938_vm4 = vmand %vm875_vm2, %vm920_vm3 }
 0x4ed   :  { %v803_v36 = vmul.f32 0.25, %v704_v24  ;;  %v706_v38 = vpop.f32.mrb[5].mxu1 }
 0x4ee   :  { %988 = vmax.xlane.f32.xlu0 %v987_v25 }
 0x4ef   :  { %v3645_v46 = vsel %vm930_vm6, %v803_v36, -1e+30 }
 0x4f0   :  { %v710_v50 = vpop.f32.mrb[6].mxu1 }
 0x4f1   :  { %v805_v31 = vmul.f32 0.25, %v710_v50  ;;  %v712_v32 = vpop.f32.mrb[7].mxu1 }
 0x4f3   :  { %v3649_v35 = vsel %vm930_vm6, %v805_v31, -1e+30  ;;  %vm922_vm6 = vcmp.lt.s32.totalorder %v3629_v56, 98 }
 0x4f4   :  { %v716_v39 = vpop.f32.mrb[8].mxu1  ;;  %vm940_vm7 = vmand %vm877_vm5, %vm922_vm6 }
 0x4f5   :  { %v807_v41 = vmul.f32 0.25, %v716_v39  ;;  %v718_v42 = vpop.f32.mrb[9].mxu1 }
 0x4f7   :  { %v3651_v43 = vsel %vm932_vm9, %v807_v41, -1e+30 }
 0x4f8   :  { %v722_v52 = vpop.f32.mrb[10].mxu1 }
 0x4f9   :  { %v809_v62 = vmul.f32 0.25, %v722_v52  ;;  %v724_v4 = vpop.f32.mrb[11].mxu1 }
 0x4fb   :  { %2916 = vrot.lane.b32.xlu1 %v3462_v29, %s3232_s2  ;;  %v3657_v7 = vsel %vm932_vm9, %v809_v62, -1e+30  ;;  %vm924_vm9 = vcmp.lt.s32.totalorder %v3629_v56, 114 }
 0x4fc   :  { %v728_v10 = vpop.f32.mrb[12].mxu1  ;;  %vm942_vm10 = vmand %vm879_vm8, %vm924_vm9 }
 0x4fd   :  { %v811_v17 = vmul.f32 0.25, %v728_v10  ;;  %v730_v51 = vpop.f32.mrb[13].mxu1 }
 0x4ff   :  { %2921 = vrot.lane.b32.xlu1 %v3474_v37, %s3232_s2  ;;  %v3661_v19 = vsel %vm934_vm12, %v811_v17, -1e+30 }
 0x500   :  { %v734_v20 = vpop.f32.mrb[14].mxu1 }
 0x501   :  { %v813_v23 = vmul.f32 0.25, %v734_v20  ;;  %v736_v28 = vpop.f32.mrb[15].mxu1  ;;  %v837_v20 = vadd.s32 128, %v3629_v56 }
 0x503   :  { %2926 = vrot.lane.b32.xlu1 %v3489_v48, %s3232_s2  ;;  %v3667_v29 = vsel %vm934_vm12, %v813_v23, -1e+30  ;;  %vm927_vm11 = vcmp.lt.s32.totalorder %v837_v20, 130  ;;  %vm2222_vm12 = vcmask 523264  }
 0x504   :  { %2911 = vrot.lane.b32.xlu0 %v3378_v58, %s3232_s2  ;;  %v740_v53 = vpop.f32.mrb[16].mxu1 }
 0x505   :  { %v815_v37 = vmul.f32 0.25, %v740_v53  ;;  %v742_v22 = vpop.f32.mrb[17].mxu1 }
 0x507   :  { %2936 = vrot.lane.b32.xlu1 %v3513_v18, %s3232_s2  ;;  %v3673_v26 = vsel %vm936_vm15, %v815_v37, -1e+30 }
 0x508   :  { %2931 = vrot.lane.b32.xlu0 %v3501_v1, %s3232_s2  ;;  %v746_v27 = vpop.f32.mrb[18].mxu1 }
 0x509   :  { %v817_v33 = vmul.f32 0.25, %v746_v27  ;;  %v748_v48 = vpop.f32.mrb[19].mxu1 }
 0x50b   :  { %v3679_v58 = vsel %vm936_vm15, %v817_v33, -1e+30 }
 0x50c   :  { %2941 = vrot.lane.b32.xlu0 %v3525_v30, %s3232_s2  ;;  %v752_v45 = vpop.f32.mrb[20].mxu1 }
 0x50d   :  { %v819_v18 = vmul.f32 0.25, %v752_v45  ;;  %v754_v55 = vpop.f32.mrb[21].mxu1 }
 0x50f   :  { %v3683_v57 = vsel %vm938_vm4, %v819_v18, -1e+30 }
 0x510   :  { %v758_v13 = vpop.f32.mrb[22].mxu1 }
 0x511   :  { %v821_v1 = vmul.f32 0.25, %v758_v13  ;;  %v760_v24 = vpop.f32.mrb[23].mxu1 }
 0x513   :  { %v3687_v25 = vsel %vm938_vm4, %v821_v1, -1e+30 }
 0x514   :  { %v764_v36 = vpop.f32.mrb[24].mxu1 }
 0x515   :  { %v823_v38 = vmul.f32 0.25, %v764_v36  ;;  %v766_v50 = vpop.f32.mrb[25].mxu1 }
 0x517   :  { %v3689_v30 = vsel %vm940_vm7, %v823_v38, -1e+30 }
 0x518   :  { %v770_v31 = vpop.f32.mrb[26].mxu1 }
 0x519   :  { %v825_v32 = vmul.f32 0.25, %v770_v31  ;;  %v772_v39 = vpop.f32.mrb[27].mxu1 }
 0x51b   :  { %v3693_v41 = vsel %vm940_vm7, %v825_v32, -1e+30 }
 0x51c   :  { %v776_v42 = vpop.f32.mrb[28].mxu1 }
 0x51d   :  { %v827_v52 = vmul.f32 0.25, %v776_v42  ;;  %v778_v62 = vpop.f32.mrb[29].mxu1 }
 0x51f   :  { %v3695_v4 = vsel %vm942_vm10, %v827_v52, -1e+30 }
 0x520   :  { %v782_v10 = vpop.f32.mrb[30].mxu1 }
 0x521   :  { %v829_v17 = vmul.f32 0.25, %v782_v10  ;;  %v784_v51 = vpop.f32.mrb[31].mxu1 }
 0x523   :  { %v3698_v23 = vsel %vm942_vm10, %v829_v17, -1e+30 }
 0x524   :  { %v788_v28 = vpop.f32.mrb[32].mxu1 }
 0x525   :  { %v790_v53 = vpop.f32.mrb[33].mxu1 }
 0x526   :  { %v832_v37 = vmul.f32 0.25, %v790_v53 }
 0x528   :  { %v3700_v22 = vsel %vm927_vm11, %v832_v37, -1e+30  ;;  %v794_v27 = vpop.f32.mrb[34].mxu1 }
 0x529   :  { %v796_v33 = vpop.f32.mrb[35].mxu1 }
 0x52a   :  { %v834_v48 = vmul.f32 0.25, %v796_v33 }
 0x52c   :  { %v3702_v45 = vsel %vm927_vm11, %v834_v48, -1e+30 }
 0x577   :  { %v985_v18 = vpop.xlane.xlu1 %984 }
 0x578   :  { %v1054_v55 = vsub.f32 %v3635_v44, %v985_v18  ;;  %v1055_v13 = vsub.f32 -1e+30, %v985_v18 }
 0x57a   :  { %v1090_v1 = vmul.f32 1.442695, %v1054_v55  ;;  %v1092_v24 = vmul.f32 1.442695, %v1055_v13 }
 0x57b   :  { %v989_v56 = vpop.xlane.xlu0 %988  ;;  %v2917_v36 = vpop.permute.xlu1 %2916 }
 0x57c   :  { %2980 = vpow2.f32 %v1090_v1  ;;  %v1056_v38 = vsub.f32 %v3641_v16, %v989_v56  ;;  %v1057_v50 = vsub.f32 -1e+30, %v989_v56  ;;  %v2919_v10 = vunpack.i.h.bf16 %v2917_v36 }
 0x57d   :  { %2982 = vpow2.f32 %v1092_v24  ;;  %v2918_v44 = vunpack.i.l.bf16 %v2917_v36 }
 0x57e   :  { %v1094_v31 = vmul.f32 1.442695, %v1056_v38  ;;  %v1096_v32 = vmul.f32 1.442695, %v1057_v50 }
 0x57f   :  { %v2912_v39 = vpop.permute.xlu0 %2911  ;;  %v2922_v62 = vpop.permute.xlu1 %2921  ;;  %v2823_v16 = vpack.c.bf16 %v2919_v10, %v2918_v44 }
 0x580   :  { %2984 = vpow2.f32 %v1094_v31  ;;  %v2914_v42 = vunpack.i.h.bf16 %v2912_v39  ;;  %v2913_v52 = vunpack.i.l.bf16 %v2912_v39  ;;  %v2924_v28 = vunpack.i.h.bf16 %v2922_v62 }
 0x581   :  { %2986 = vpow2.f32 %v1096_v32  ;;  %v2923_v53 = vunpack.i.l.bf16 %v2922_v62 }
 0x582   :  { %v2820_v17 = vpack.c.bf16 %v2914_v42, %v2913_v52 }
 0x583   :  { %v2927_v37 = vpop.permute.xlu1 %2926  ;;  %v2826_v55 = vpack.c.bf16 %v2924_v28, %v2923_v53  ;;  %v2932_v24 = vpop.permute.xlu0 %2931  ;;  %v991_v28 = vmax.f32 %v3645_v46, %v3633_v34  ;;  %v995_v53 = vmax.f32 %v3649_v35, %v3633_v34 }
 0x584   :  { %2821 = vmatpush1.bf16.msra.mxu0 %v2820_v17  ;;  %v2929_v13 = vunpack.i.h.bf16 %v2927_v37  ;;  %v2928_v1 = vunpack.i.l.bf16 %v2927_v37  ;;  %v2934_v50 = vunpack.i.h.bf16 %v2932_v24  ;;  %v2933_v31 = vunpack.i.l.bf16 %v2932_v24 }
 0x585   :  { %2822 = vmatprep.subr.bf16.mxu0 %v3238_v21  ;;  %v999_v37 = vmax.f32 %v3651_v43, %v3633_v34  ;;  %v1027_v24 = vmax.f32 %v3687_v25, %v3633_v34 }
 0x586   :  { %v3706_v51 = vpop.eup %2980  ;;  %v2829_v38 = vpack.c.bf16 %v2929_v13, %v2928_v1  ;;  %v2832_v39 = vpack.c.bf16 %v2934_v50, %v2933_v31  ;;  %v1019_v13 = vmax.f32 %v3679_v58, %v3633_v34  ;;  %v1031_v1 = vmax.f32 %v3689_v30, %v3633_v34 }
 0x587   :  { %v3709_v20 = vpop.eup %2982  ;;  %v2937_v32 = vpop.permute.xlu1 %2936  ;;  %v1043_v31 = vmax.f32 %v3698_v23, %v3633_v34 }
 0x588   :  { %2824 = vmatpush1.bf16.msra.mxu0 %v2823_v16  ;;  %v1162_v27 = vsel %vm367_vm1, %v3709_v20, 0.0  ;;  %v2939_v42 = vunpack.i.h.bf16 %v2937_v32  ;;  %v2938_v52 = vunpack.i.l.bf16 %v2937_v32  ;;  %v2942_v62 = vpop.permute.xlu0 %2941  ;;  %v1050_v32 = vsel %vm367_vm1, %v3702_v45, -inf }
 0x589   :  { %v1163_v48 = vadd.f32 %v3706_v51, %v1162_v27  ;;  %2825 = vmatprep.subr.bf16.mxu0 %v3238_v21  ;;  %v2944_v44 = vunpack.i.h.bf16 %v2942_v62  ;;  %v2943_v17 = vunpack.i.l.bf16 %v2942_v62  ;;  %v1007_v27 = vmax.f32 %v3661_v19, %v3633_v34 }
 0x58a   :  { %v3713_v33 = vpop.eup %2984  ;;  %v2835_v10 = vpack.c.bf16 %v2939_v42, %v2938_v52  ;;  %v2974_v42 = vld [vmem:[#allocation5 + $0x88] sm:$0xff]  }
 0x58b   :  { %v3717_v18 = vpop.eup %2986  ;;  %1164 = vadd.xlane.f32.xlu0 %v1163_v48  ;;  %v2838_v16 = vpack.c.bf16 %v2944_v44, %v2943_v17  ;;  %v1011_v48 = vmax.f32 %v3667_v29, %v3633_v34  ;;  %2664 = vmatpush3.bf16.msra.mxu1 %v2974_v42 }
 0x58c   :  { %v1166_v56 = vsel %vm367_vm1, %v3717_v18, 0.0  ;;  %2827 = vmatpush1.bf16.msra.mxu0 %v2826_v55  ;;  %v1023_v55 = vmax.f32 %v3683_v57, %v3633_v34  ;;  %2739 = vmatprep.subr.bf16.mxu1 %v3230_v0 }
 0x58d   :  { %v1167_v36 = vadd.f32 %v3713_v33, %v1166_v56  ;;  %2828 = vmatprep.subr.bf16.mxu0 %v3238_v21  ;;  %v1039_v56 = vmax.f32 %v3695_v4, %v3633_v34 }
 0x58f   :  { %1168 = vadd.xlane.f32.xlu1 %v1167_v36  ;;  %v1035_v36 = vmax.f32 %v3693_v41, %v3633_v34 }
 0x590   :  { %2830 = vmatpush1.bf16.msra.mxu0 %v2829_v38  ;;  %v1046_v38 = vsel %vm367_vm1, %v3700_v22, -inf }
 0x591   :  { %2831 = vmatprep.subr.bf16.mxu0 %v3238_v21  ;;  %v1047_v50 = vmax.f32 %v1046_v38, -1e+30 }
 0x594   :  { %2833 = vmatpush1.bf16.msra.mxu0 %v2832_v39  ;;  %v1051_v39 = vmax.f32 %v1050_v32, -1e+30 }
 0x595   :  { %2834 = vmatprep.subr.bf16.mxu0 %v3238_v21 }
 0x598   :  { %2836 = vmatpush1.bf16.msra.mxu0 %v2835_v10 }
 0x599   :  { %2837 = vmatprep.subr.bf16.mxu0 %v3238_v21 }
 0x59c   :  { %2839 = vmatpush1.bf16.msra.mxu0 %v2838_v16 }
 0x59d   :  { %2840 = vmatprep.subr.bf16.mxu0 %v3238_v21 }
 0x5a0   :  { %2951 = vrot.lane.b32.xlu1 %v3549_v54, %s3232_s2  ;;  %v1003_v54 = vmax.f32 %v3657_v7, %v3633_v34 }
 0x5a1   :  { %2946 = vrot.lane.b32.xlu0 %v3537_v40, %s3232_s2  ;;  %v1015_v40 = vmax.f32 %v3673_v26, %v3633_v34 }
 0x5c0   :  { %992 = vmax.xlane.f32.xlu0 %v991_v28 }
 0x5c4   :  { %996 = vmax.xlane.f32.xlu1 %v995_v53  ;;  %1000 = vmax.xlane.f32.xlu0 %v999_v37 }
 0x5c8   :  { %1008 = vmax.xlane.f32.xlu1 %v1007_v27  ;;  %1004 = vmax.xlane.f32.xlu0 %v1003_v54 }
 0x5cc   :  { %1016 = vmax.xlane.f32.xlu1 %v1015_v40  ;;  %1012 = vmax.xlane.f32.xlu0 %v1011_v48 }
 0x5d0   :  { %1024 = vmax.xlane.f32.xlu1 %v1023_v55  ;;  %1020 = vmax.xlane.f32.xlu0 %v1019_v13 }
 0x5d4   :  { %1032 = vmax.xlane.f32.xlu1 %v1031_v1  ;;  %1028 = vmax.xlane.f32.xlu0 %v1027_v24 }
 0x5d8   :  { %1040 = vmax.xlane.f32.xlu1 %v1039_v56  ;;  %1036 = vmax.xlane.f32.xlu0 %v1035_v36 }
 0x5dc   :  { %1048 = vmax.xlane.f32.xlu1 %v1047_v50  ;;  %1044 = vmax.xlane.f32.xlu0 %v1043_v31 }
 0x5e0   :  { %1052 = vmax.xlane.f32.xlu0 %v1051_v39 }
 0x618   :  { %v1165_v52 = vpop.xlane.xlu0 %1164 }
 0x619   :  { %2988 = vrcp.f32 %v1165_v52 }
 0x61c   :  { %v1169_v62 = vpop.xlane.xlu1 %1168  ;;  %v2947_v10 = vpop.permute.xlu0 %2946 }
 0x61d   :  { %2990 = vrcp.f32 %v1169_v62  ;;  %v2949_v44 = vunpack.i.h.bf16 %v2947_v10  ;;  %v2948_v17 = vunpack.i.l.bf16 %v2947_v10 }
 0x61f   :  { %v2841_v16 = vpack.c.bf16 %v2949_v44, %v2948_v17 }
 0x620   :  { %v2952_v34 = vpop.permute.xlu1 %2951 }
 0x621   :  { %v2954_v28 = vunpack.i.h.bf16 %v2952_v34  ;;  %v2953_v53 = vunpack.i.l.bf16 %v2952_v34  ;;  %2842 = vmatpush1.bf16.msra.mxu0 %v2841_v16 }
 0x622   :  { %2843 = vmatprep.subr.bf16.mxu0 %v3238_v21 }
 0x623   :  { %v2844_v37 = vpack.c.bf16 %v2954_v28, %v2953_v53  ;;  %v2989_v27 = vpop.eup %2988 }
 0x624   :  { %v1253_v54 = vmul.f32 %v2989_v27, %v3709_v20  ;;  %v1252_v48 = vmul.f32 %v2989_v27, %v3706_v51 }
 0x625   :  { %2845 = vmatpush1.bf16.msra.mxu0 %v2844_v37 }
 0x626   :  { %2466 = vmatprep.mubr.msk.f32.mxu0 %vm367_vm1, %v1253_v54  ;;  %2701 = vmatprep.subr.bf16.mxu0 %v3230_v0 }
 0x627   :  { %v2991_v40 = vpop.eup %2990 }
 0x628   :  { %v1255_v55 = vmul.f32 %v2991_v40, %v3717_v18  ;;  %1461 = vmatmul.mubr.f32.vlgmr.msra.gmra.mrb[44].mxu0 %v1252_v48  ;;  %v1254_v13 = vmul.f32 %v2991_v40, %v3713_v33 }
 0x62a   :  { %2467 = vmatprep.mubr.msk.f32.mxu0 %vm367_vm1, %v1255_v55 }
 0x62c   :  { %1466 = vmatmul.mubr.f32.gmra.mrb[46].mxu0 %v1254_v13 }
 0x64d   :  { %v993_v21 = vpop.xlane.xlu0 %992 }
 0x64e   :  { %v1058_v1 = vsub.f32 %v3645_v46, %v993_v21  ;;  %v1059_v20 = vsub.f32 -1e+30, %v993_v21 }
 0x650   :  { %v1098_v24 = vmul.f32 1.442695, %v1058_v1  ;;  %v1100_v56 = vmul.f32 1.442695, %v1059_v20 }
 0x651   :  { %v997_v36 = vpop.xlane.xlu1 %996  ;;  %v1001_v50 = vpop.xlane.xlu0 %1000 }
 0x652   :  { %v1060_v51 = vsub.f32 %v3649_v35, %v997_v36  ;;  %v1061_v38 = vsub.f32 -1e+30, %v997_v36  ;;  %2992 = vpow2.f32 %v1098_v24  ;;  %v1062_v18 = vsub.f32 %v3651_v43, %v1001_v50 }
 0x653   :  { %v1063_v31 = vsub.f32 -1e+30, %v1001_v50  ;;  %2994 = vpow2.f32 %v1100_v56 }
 0x654   :  { %v1102_v32 = vmul.f32 1.442695, %v1060_v51  ;;  %v1104_v39 = vmul.f32 1.442695, %v1061_v38  ;;  %v1106_v33 = vmul.f32 1.442695, %v1062_v18 }
 0x655   :  { %v1108_v42 = vmul.f32 1.442695, %v1063_v31  ;;  %v1009_v52 = vpop.xlane.xlu1 %1008  ;;  %v1005_v46 = vpop.xlane.xlu0 %1004 }
 0x656   :  { %2996 = vpow2.f32 %v1102_v32  ;;  %v1066_v62 = vsub.f32 %v3661_v19, %v1009_v52  ;;  %v1067_v10 = vsub.f32 -1e+30, %v1009_v52  ;;  %v1064_v35 = vsub.f32 %v3657_v7, %v1005_v46 }
 0x657   :  { %2998 = vpow2.f32 %v1104_v39  ;;  %v1065_v44 = vsub.f32 -1e+30, %v1005_v46 }
 0x658   :  { %3000 = vpow2.f32 %v1106_v33  ;;  %v1114_v17 = vmul.f32 1.442695, %v1066_v62  ;;  %v1110_v43 = vmul.f32 1.442695, %v1064_v35  ;;  %v1116_v34 = vmul.f32 1.442695, %v1067_v10 }
 0x659   :  { %3002 = vpow2.f32 %v1108_v42  ;;  %v1112_v16 = vmul.f32 1.442695, %v1065_v44  ;;  %v1017_v28 = vpop.xlane.xlu1 %1016  ;;  %v1013_v53 = vpop.xlane.xlu0 %1012 }
 0x65a   :  { %3004 = vpow2.f32 %v1114_v17  ;;  %v1070_v37 = vsub.f32 %v3673_v26, %v1017_v28  ;;  %v1071_v27 = vsub.f32 -1e+30, %v1017_v28  ;;  %v1068_v19 = vsub.f32 %v3667_v29, %v1013_v53 }
 0x65b   :  { %3006 = vpow2.f32 %v1110_v43  ;;  %v1069_v54 = vsub.f32 -1e+30, %v1013_v53 }
 0x65c   :  { %3008 = vpow2.f32 %v1112_v16  ;;  %v1122_v40 = vmul.f32 1.442695, %v1070_v37  ;;  %v3779_v7 = vpop.eup %2992  ;;  %v1118_v48 = vmul.f32 1.442695, %v1068_v19  ;;  %v1124_v13 = vmul.f32 1.442695, %v1071_v27 }
 0x65d   :  { %3010 = vpow2.f32 %v1116_v34  ;;  %v1120_v55 = vmul.f32 1.442695, %v1069_v54  ;;  %v1025_v21 = vpop.xlane.xlu1 %1024  ;;  %v3781_v1 = vpop.eup %2994 }
 0x65e   :  { %3012 = vpow2.f32 %v1122_v40  ;;  %v1021_v20 = vpop.xlane.xlu0 %1020  ;;  %v1074_v26 = vsub.f32 %v3683_v57, %v1025_v21  ;;  %v1075_v24 = vsub.f32 -1e+30, %v1025_v21  ;;  %v1170_v36 = vsel %vm367_vm1, %v3781_v1, 0.0 }
 0x65f   :  { %3014 = vpow2.f32 %v1118_v48  ;;  %v1072_v29 = vsub.f32 %v3679_v58, %v1021_v20  ;;  %v1073_v56 = vsub.f32 -1e+30, %v1021_v20  ;;  %v1171_v50 = vadd.f32 %v3779_v7, %v1170_v36 }
 0x660   :  { %v3787_v51 = vpop.eup %2996  ;;  %3016 = vpow2.f32 %v1120_v55  ;;  %v1130_v38 = vmul.f32 1.442695, %v1074_v26  ;;  %v1132_v57 = vmul.f32 1.442695, %v1075_v24 }
 0x661   :  { %v3790_v18 = vpop.eup %2998  ;;  %3018 = vpow2.f32 %v1124_v13  ;;  %v1126_v31 = vmul.f32 1.442695, %v1072_v29  ;;  %v1128_v32 = vmul.f32 1.442695, %v1073_v56  ;;  %v1033_v39 = vpop.xlane.xlu1 %1032  ;;  %1172 = vadd.xlane.f32.xlu1 %v1171_v50 }
 0x662   :  { %v3792_v33 = vpop.eup %3000  ;;  %3020 = vpow2.f32 %v1130_v38  ;;  %v1029_v58 = vpop.xlane.xlu0 %1028  ;;  %v1078_v42 = vsub.f32 %v3689_v30, %v1033_v39  ;;  %v1079_v52 = vsub.f32 -1e+30, %v1033_v39  ;;  %v1174_v46 = vsel %vm367_vm1, %v3790_v18, 0.0 }
 0x663   :  { %v3797_v62 = vpop.eup %3002  ;;  %3022 = vpow2.f32 %v1126_v31  ;;  %v1076_v10 = vsub.f32 %v3687_v25, %v1029_v58  ;;  %v1077_v35 = vsub.f32 -1e+30, %v1029_v58  ;;  %v1175_v44 = vadd.f32 %v3787_v51, %v1174_v46 }
 0x664   :  { %v3801_v17 = vpop.eup %3004  ;;  %3024 = vpow2.f32 %v1128_v32  ;;  %v1138_v43 = vmul.f32 1.442695, %v1078_v42  ;;  %v1140_v16 = vmul.f32 1.442695, %v1079_v52  ;;  %v1178_v30 = vsel %vm367_vm1, %v3797_v62, 0.0 }
 0x665   :  { %v3805_v34 = vpop.eup %3006  ;;  %3026 = vpow2.f32 %v1132_v57  ;;  %v1134_v28 = vmul.f32 1.442695, %v1076_v10  ;;  %v1136_v53 = vmul.f32 1.442695, %v1077_v35  ;;  %v1179_v37 = vadd.f32 %v3792_v33, %v1178_v30  ;;  %1176 = vadd.xlane.f32.xlu0 %v1175_v44  ;;  %v1041_v25 = vpop.xlane.xlu1 %1040 }
 0x666   :  { %v3808_v27 = vpop.eup %3008  ;;  %3028 = vpow2.f32 %v1138_v43  ;;  %v1037_v19 = vpop.xlane.xlu0 %1036  ;;  %v1082_v54 = vsub.f32 %v3695_v4, %v1041_v25  ;;  %v1083_v40 = vsub.f32 -1e+30, %v1041_v25 }
 0x667   :  { %v3811_v48 = vpop.eup %3010  ;;  %3030 = vpow2.f32 %v1134_v28  ;;  %1180 = vadd.xlane.f32.xlu1 %v1179_v37  ;;  %v1080_v55 = vsub.f32 %v3693_v41, %v1037_v19  ;;  %v1081_v13 = vsub.f32 -1e+30, %v1037_v19  ;;  %v1182_v21 = vsel %vm367_vm1, %v3808_v27, 0.0 }
 0x668   :  { %v3816_v20 = vpop.eup %3012  ;;  %3032 = vpow2.f32 %v1136_v53  ;;  %v1146_v26 = vmul.f32 1.442695, %v1082_v54  ;;  %v1148_v24 = vmul.f32 1.442695, %v1083_v40  ;;  %v1186_v29 = vsel %vm367_vm1, %v3811_v48, 0.0 }
 0x669   :  { %v3820_v4 = vpop.eup %3014  ;;  %3034 = vpow2.f32 %v1140_v16  ;;  %v1142_v56 = vmul.f32 1.442695, %v1080_v55  ;;  %v1144_v36 = vmul.f32 1.442695, %v1081_v13  ;;  %v1187_v38 = vadd.f32 %v3801_v17, %v1186_v29  ;;  %v1049_v41 = vpop.xlane.xlu1 %1048 }
 0x66a   :  { %v3823_v50 = vpop.eup %3016  ;;  %3036 = vpow2.f32 %v1146_v26  ;;  %v1183_v31 = vadd.f32 %v3805_v34, %v1182_v21  ;;  %v1045_v32 = vpop.xlane.xlu0 %1044  ;;  %v1086_v57 = vsub.f32 -1e+30, %v1049_v41  ;;  %v1087_v39 = vsub.f32 %v3700_v22, %v1049_v41 }
 0x66b   :  { %v3827_v58 = vpop.eup %3018  ;;  %3038 = vpow2.f32 %v1142_v56  ;;  %1188 = vadd.xlane.f32.xlu1 %v1187_v38  ;;  %v1084_v42 = vsub.f32 %v3698_v23, %v1045_v32  ;;  %v1085_v52 = vsub.f32 -1e+30, %v1045_v32  ;;  %v1190_v46 = vsel %vm367_vm1, %v3823_v50, 0.0 }
 0x66c   :  { %v3832_v10 = vpop.eup %3020  ;;  %3040 = vpow2.f32 %v1144_v36  ;;  %1184 = vadd.xlane.f32.xlu0 %v1183_v31  ;;  %v1154_v35 = vmul.f32 1.442695, %v1086_v57  ;;  %v1156_v44 = vmul.f32 1.442695, %v1087_v39  ;;  %v1194_v43 = vsel %vm367_vm1, %v3827_v58, 0.0 }
 0x66d   :  { %v3836_v22 = vpop.eup %3022  ;;  %3042 = vpow2.f32 %v1148_v24  ;;  %v1150_v16 = vmul.f32 1.442695, %v1084_v42  ;;  %v1152_v30 = vmul.f32 1.442695, %v1085_v52  ;;  %v1195_v23 = vadd.f32 %v3816_v20, %v1194_v43 }
 0x66e   :  { %v3839_v28 = vpop.eup %3024  ;;  %3044 = vpow2.f32 %v1154_v35  ;;  %v1191_v53 = vadd.f32 %v3820_v4, %v1190_v46  ;;  %v1053_v37 = vpop.xlane.xlu0 %1052 }
 0x66f   :  { %v3842_v25 = vpop.eup %3026  ;;  %3046 = vpow2.f32 %v1150_v16  ;;  %1196 = vadd.xlane.f32.xlu1 %v1195_v23  ;;  %v1088_v19 = vsub.f32 -1e+30, %v1053_v37  ;;  %v1089_v54 = vsub.f32 %v3702_v45, %v1053_v37  ;;  %v1198_v40 = vsel %vm367_vm1, %v3839_v28, 0.0 }
 0x670   :  { %v3847_v55 = vpop.eup %3028  ;;  %3048 = vpow2.f32 %v1152_v30  ;;  %1192 = vadd.xlane.f32.xlu0 %v1191_v53  ;;  %v1202_v13 = vsel %vm367_vm1, %v3842_v25, 0.0  ;;  %v1199_v21 = vadd.f32 %v3836_v22, %v1198_v40 }
 0x671   :  { %v3852_v26 = vpop.eup %3030  ;;  %3050 = vpow2.f32 %v1156_v44  ;;  %v1158_v24 = vmul.f32 1.442695, %v1088_v19  ;;  %v1160_v29 = vmul.f32 1.442695, %v1089_v54  ;;  %v1203_v56 = vadd.f32 %v3832_v10, %v1202_v13 }
 0x672   :  { %v3855_v45 = vpop.eup %3032 }
 0x673   :  { %v3857_v36 = vpop.eup %3034  ;;  %3052 = vpow2.f32 %v1158_v24  ;;  %1204 = vadd.xlane.f32.xlu1 %v1203_v56  ;;  %v1206_v38 = vsel %vm367_vm1, %v3855_v45, 0.0 }
 0x674   :  { %v3861_v41 = vpop.eup %3036  ;;  %3054 = vpow2.f32 %v1160_v29  ;;  %1200 = vadd.xlane.f32.xlu0 %v1199_v21  ;;  %v1210_v31 = vsel %vm367_vm1, %v3857_v36, 0.0  ;;  %v1207_v32 = vadd.f32 %v3852_v26, %v1206_v38 }
 0x675   :  { %v3866_v57 = vpop.eup %3038  ;;  %v1211_v39 = vadd.f32 %v3847_v55, %v1210_v31 }
 0x676   :  { %v3869_v42 = vpop.eup %3040 }
 0x677   :  { %v3871_v52 = vpop.eup %3042  ;;  %1212 = vadd.xlane.f32.xlu1 %v1211_v39  ;;  %v1214_v46 = vsel %vm367_vm1, %v3869_v42, 0.0 }
 0x678   :  { %v3875_v35 = vpop.eup %3044  ;;  %1208 = vadd.xlane.f32.xlu0 %v1207_v32  ;;  %v1218_v44 = vsel %vm367_vm1, %v3871_v52, 0.0  ;;  %v1215_v43 = vadd.f32 %v3866_v57, %v1214_v46 }
 0x679   :  { %v3880_v16 = vpop.eup %3046  ;;  %v1219_v30 = vadd.f32 %v3861_v41, %v1218_v44 }
 0x67a   :  { %v3883_v23 = vpop.eup %3048 }
 0x67b   :  { %v3885_v53 = vpop.eup %3050  ;;  %1220 = vadd.xlane.f32.xlu1 %v1219_v30  ;;  %v1222_v37 = vsel %vm367_vm1, %v3883_v23, 0.0 }
 0x67c   :  { %1216 = vadd.xlane.f32.xlu0 %v1215_v43  ;;  %v1226_v19 = vsel %vm367_vm1, %v3885_v53, 0.0  ;;  %v1223_v54 = vadd.f32 %v3880_v16, %v1222_v37 }
 0x67d   :  { %v3892_v40 = vpop.eup %3052  ;;  %v1227_v13 = vadd.f32 %v3875_v35, %v1226_v19 }
 0x67e   :  { %v3895_v21 = vpop.eup %3054 }
 0x67f   :  { %1228 = vadd.xlane.f32.xlu1 %v1227_v13  ;;  %v1230_v24 = vsel %vm367_vm1, %v3895_v21, 0.0 }
 0x680   :  { %1224 = vadd.xlane.f32.xlu0 %v1223_v54  ;;  %v1231_v29 = vadd.f32 %v3892_v40, %v1230_v24 }
 0x684   :  { %1232 = vadd.xlane.f32.xlu0 %v1231_v29 }
 0x6ee   :  { %v1173_v56 = vpop.xlane.xlu1 %1172 }
 0x6ef   :  { %3056 = vrcp.f32 %v1173_v56 }
 0x6f2   :  { %v1177_v38 = vpop.xlane.xlu0 %1176 }
 0x6f3   :  { %3058 = vrcp.f32 %v1177_v38 }
 0x6f4   :  { %v1181_v31 = vpop.xlane.xlu1 %1180 }
 0x6f5   :  { %3060 = vrcp.f32 %v1181_v31 }
 0x6f8   :  { %v1189_v32 = vpop.xlane.xlu1 %1188 }
 0x6f9   :  { %v1185_v39 = vpop.xlane.xlu0 %1184  ;;  %v3057_v46 = vpop.eup %3056 }
 0x6fa   :  { %3062 = vrcp.f32 %v1185_v39  ;;  %v1257_v44 = vmul.f32 %v3057_v46, %v3781_v1  ;;  %v1256_v43 = vmul.f32 %v3057_v46, %v3779_v7 }
 0x6fb   :  { %3064 = vrcp.f32 %v1189_v32  ;;  %v1462_v30 = vpop.f32.mrb[44].mxu0 }
 0x6fc   :  { %2468 = vmatprep.mubr.msk.f32.mxu0 %vm367_vm1, %v1257_v44  ;;  %v1464_v54 = vpop.f32.mrb[45].mxu0  ;;  %v1197_v1 = vpop.xlane.xlu1 %1196 }
 0x6fd   :  { %v3059_v37 = vpop.eup %3058  ;;  %v1193_v19 = vpop.xlane.xlu0 %1192  ;;  %1471 = vmatmul.mubr.f32.gmra.mrb[48].mxu0 %v1256_v43 }
 0x6fe   :  { %v1259_v13 = vmul.f32 %v3059_v37, %v3790_v18  ;;  %v1258_v24 = vmul.f32 %v3059_v37, %v3787_v51  ;;  %3066 = vrcp.f32 %v1193_v19 }
 0x6ff   :  { %v3061_v29 = vpop.eup %3060  ;;  %v1467_v56 = vpop.f32.mrb[46].mxu0  ;;  %3068 = vrcp.f32 %v1197_v1 }
 0x700   :  { %2469 = vmatprep.mubr.msk.f32.mxu0 %vm367_vm1, %v1259_v13  ;;  %v1551_v38 = vpack.c.bf16 %v1467_v56, %v1462_v30  ;;  %v1469_v7 = vpop.f32.mrb[47].mxu0  ;;  %v1261_v31 = vmul.f32 %v3061_v29, %v3797_v62  ;;  %v1260_v18 = vmul.f32 %v3061_v29, %v3792_v33  ;;  %v1205_v44 = vpop.xlane.xlu1 %1204 }
 0x701   :  { %1476 = vmatmul.mubr.f32.gmra.mrb[50].mxu0 %v1258_v24  ;;  %v1201_v51 = vpop.xlane.xlu0 %1200 }
 0x702   :  { %2470 = vmatprep.mubr.msk.f32.mxu0 %vm367_vm1, %v1261_v31  ;;  %2666 = vmatmul.mubr.msk.bf16.vlgmr.msra.gmra.mrb[36].mxu1 %vm367_vm1, %v1551_v38  ;;  %3070 = vrcp.f32 %v1201_v51 }
 0x703   :  { %2669 = vmatprep.mubr.msk.bf16.mxu1 %vm3231_vm0, %v3230_v0  ;;  %3072 = vrcp.f32 %v1205_v44 }
 0x704   :  { %v3063_v32 = vpop.eup %3062  ;;  %v1213_v54 = vpop.xlane.xlu1 %1212 }
 0x705   :  { %v1263_v39 = vmul.f32 %v3063_v32, %v3808_v27  ;;  %v3065_v46 = vpop.eup %3064  ;;  %1481 = vmatmul.mubr.f32.gmra.mrb[52].mxu0 %v1260_v18  ;;  %v1262_v62 = vmul.f32 %v3063_v32, %v3805_v34  ;;  %v1209_v37 = vpop.xlane.xlu0 %1208 }
 0x706   :  { %v1265_v43 = vmul.f32 %v3065_v46, %v3811_v48  ;;  %v1264_v33 = vmul.f32 %v3065_v46, %v3801_v17  ;;  %3074 = vrcp.f32 %v1209_v37 }
 0x707   :  { %2471 = vmatprep.mubr.msk.f32.mxu0 %vm367_vm1, %v1263_v39  ;;  %3076 = vrcp.f32 %v1213_v54 }
 0x708   :  { %v3067_v30 = vpop.eup %3066  ;;  %v1221_v56 = vpop.xlane.xlu1 %1220 }
 0x709   :  { %1486 = vmatmul.mubr.f32.gmra.mrb[54].mxu0 %v1262_v62  ;;  %v1267_v27 = vmul.f32 %v3067_v30, %v3823_v50  ;;  %v3069_v19 = vpop.eup %3068  ;;  %v1266_v34 = vmul.f32 %v3067_v30, %v3820_v4  ;;  %v1217_v24 = vpop.xlane.xlu0 %1216 }
 0x70a   :  { %2472 = vmatprep.mubr.msk.f32.mxu0 %vm367_vm1, %v1265_v43  ;;  %v1269_v48 = vmul.f32 %v3069_v19, %v3827_v58  ;;  %v1268_v17 = vmul.f32 %v3069_v19, %v3816_v20  ;;  %3078 = vrcp.f32 %v1217_v24 }
 0x70b   :  { %3080 = vrcp.f32 %v1221_v56 }
 0x70c   :  { %v3071_v13 = vpop.eup %3070  ;;  %v1229_v31 = vpop.xlane.xlu1 %1228 }
 0x70d   :  { %1491 = vmatmul.mubr.f32.gmra.mrb[56].mxu0 %v1264_v33  ;;  %v1271_v50 = vmul.f32 %v3071_v13, %v3839_v28  ;;  %v3073_v29 = vpop.eup %3072  ;;  %v1270_v4 = vmul.f32 %v3071_v13, %v3836_v22  ;;  %v1225_v38 = vpop.xlane.xlu0 %1224 }
 0x70e   :  { %2473 = vmatprep.mubr.msk.f32.mxu0 %vm367_vm1, %v1267_v27  ;;  %v1273_v58 = vmul.f32 %v3073_v29, %v3842_v25  ;;  %v1272_v20 = vmul.f32 %v3073_v29, %v3832_v10  ;;  %3082 = vrcp.f32 %v1225_v38 }
 0x70f   :  { %3084 = vrcp.f32 %v1229_v31 }
 0x710   :  { %v3075_v1 = vpop.eup %3074 }
 0x711   :  { %1496 = vmatmul.mubr.f32.gmra.mrb[58].mxu0 %v1266_v34  ;;  %v1275_v28 = vmul.f32 %v3075_v1, %v3855_v45  ;;  %v3077_v7 = vpop.eup %3076  ;;  %v1274_v22 = vmul.f32 %v3075_v1, %v3852_v26  ;;  %v1233_v18 = vpop.xlane.xlu0 %1232 }
 0x712   :  { %2474 = vmatprep.mubr.msk.f32.mxu0 %vm367_vm1, %v1269_v48  ;;  %v1277_v25 = vmul.f32 %v3077_v7, %v3857_v36  ;;  %v1276_v10 = vmul.f32 %v3077_v7, %v3847_v55  ;;  %3086 = vrcp.f32 %v1233_v18  ;;  %v3128_v48 = vld [vmem:[#allocation7 + $0x40] ss:$0 sm:$0xff] }
 0x714   :  { %v3079_v32 = vpop.eup %3078 }
 0x715   :  { %1501 = vmatmul.mubr.f32.gmra.mrb[60].mxu0 %v1268_v17  ;;  %v1279_v45 = vmul.f32 %v3079_v32, %v3869_v42  ;;  %v3081_v51 = vpop.eup %3080  ;;  %v1278_v26 = vmul.f32 %v3079_v32, %v3866_v57 }
 0x716   :  { %2475 = vmatprep.mubr.msk.f32.mxu0 %vm367_vm1, %v1271_v50  ;;  %v1281_v39 = vmul.f32 %v3081_v51, %v3871_v52  ;;  %v1280_v46 = vmul.f32 %v3081_v51, %v3861_v41 }
 0x718   :  { %v3083_v36 = vpop.eup %3082 }
 0x719   :  { %1506 = vmatmul.mubr.f32.gmra.mrb[62].mxu0 %v1270_v4  ;;  %v1283_v55 = vmul.f32 %v3083_v36, %v3883_v23  ;;  %v3085_v62 = vpop.eup %3084  ;;  %v1282_v42 = vmul.f32 %v3083_v36, %v3880_v16 }
 0x71a   :  { %2476 = vmatprep.mubr.msk.f32.mxu0 %vm367_vm1, %v1273_v58  ;;  %v1285_v44 = vmul.f32 %v3085_v62, %v3885_v53  ;;  %v1284_v57 = vmul.f32 %v3085_v62, %v3875_v35  ;;  %v3953_v53 = vld [vmem:[#allocation7 + $0x50] ss:$0 sm:$0xff] }
 0x71c   :  { %v3087_v43 = vpop.eup %3086 }
 0x71d   :  { %1511 = vmatmul.mubr.f32.gmra.mrb[64].mxu0 %v1272_v20  ;;  %v1287_v52 = vmul.f32 %v3087_v43, %v3895_v21  ;;  %v1286_v41 = vmul.f32 %v3087_v43, %v3892_v40 }
 0x71e   :  { %2477 = vmatprep.mubr.msk.f32.mxu0 %vm367_vm1, %v1275_v28 }
 0x721   :  { %1516 = vmatmul.mubr.f32.gmra.mrb[66].mxu0 %v1274_v22 }
 0x722   :  { %2478 = vmatprep.mubr.msk.f32.mxu0 %vm367_vm1, %v1277_v25 }
 0x725   :  { %1521 = vmatmul.mubr.f32.gmra.mrb[68].mxu0 %v1276_v10 }
 0x726   :  { %2479 = vmatprep.mubr.msk.f32.mxu0 %vm367_vm1, %v1279_v45 }
 0x729   :  { %1526 = vmatmul.mubr.f32.gmra.mrb[70].mxu0 %v1278_v26 }
 0x72a   :  { %2480 = vmatprep.mubr.msk.f32.mxu0 %vm367_vm1, %v1281_v39 }
 0x72d   :  { %1531 = vmatmul.mubr.f32.gmra.mrb[72].mxu0 %v1280_v46 }
 0x72e   :  { %2481 = vmatprep.mubr.msk.f32.mxu0 %vm367_vm1, %v1283_v55 }
 0x731   :  { %1536 = vmatmul.mubr.f32.gmra.mrb[74].mxu0 %v1282_v42 }
 0x732   :  { %2482 = vmatprep.mubr.msk.f32.mxu0 %vm367_vm1, %v1285_v44 }
 0x735   :  { %1541 = vmatmul.mubr.f32.gmra.mrb[76].mxu0 %v1284_v57 }
 0x736   :  { %2483 = vmatprep.mubr.msk.f32.mxu0 %vm367_vm1, %v1287_v52 }
 0x739   :  { %1546 = vmatmul.mubr.f32.gmra.mrb[78].mxu0 %v1286_v41 }
 0x73a   :  { %2703 = vmatprep.mubr.msk.bf16.mxu0 %vm3231_vm0, %v3230_v0 }
 0x7d0   :  { %v1472_v16 = vpop.f32.mrb[48].mxu0 }
 0x7d1   :  { %v1474_v23 = vpop.f32.mrb[49].mxu0 }
 0x7d4   :  { %v1477_v30 = vpop.f32.mrb[50].mxu0 }
 0x7d5   :  { %v1552_v33 = vpack.c.bf16 %v1477_v30, %v1472_v16  ;;  %v1479_v37 = vpop.f32.mrb[51].mxu0  ;;  %v1634_v27 = vpop.f32.mrb[36].mxu1 }
 0x7d6   :  { %v1635_v35 = vadd.f32 %v3953_v53, %v1634_v27  ;;  %v2667_v21 = vpop.f32.mrb[37].mxu1  ;;  %v2975_v27 = vld [vmem:[#allocation5 + $0x90] sm:$0xff]  }
 0x7d7   :  { %2670 = vmatmul.mubr.msk.bf16.gmra.mrb[40].mxu1 %vm367_vm1, %v1552_v33  ;;  %v1637_v19 = vpop.f32.mrb[38].mxu1  ;;  %2702 = vmatpush3.bf16.msra.mxu0 %v2975_v27 }
 0x7d8   :  { %v1482_v34 = vpop.f32.mrb[52].mxu0  ;;  %v1638_v40 = vadd.f32 %v3953_v53, %v1637_v19  ;;  %v2668_v54 = vpop.f32.mrb[39].mxu1  ;;  %v1705_v13 = vadd.f32 %v3128_v48, %v1635_v35  ;;  %2673 = vmatprep.mubr.msk.bf16.mxu1 %vm3231_vm0, %v3230_v0 }
 0x7d9   :  { %v1484_v17 = vpop.f32.mrb[53].mxu0 }
 0x7da   :  { %v1725_v24 = vsel %vm367_vm1, %v1705_v13, 0.0  ;;  %v1706_v50 = vadd.f32 %v3128_v48, %v1638_v40 }
 0x7db   :  { %1726 = vadd.xlane.f32.xlu1 %v1725_v24 }
 0x7dc   :  { %v1487_v29 = vpop.f32.mrb[54].mxu0  ;;  %v1728_v4 = vsel %vm367_vm1, %v1706_v50, 0.0 }
 0x7dd   :  { %v1553_v56 = vpack.c.bf16 %v1487_v29, %v1482_v34  ;;  %v1489_v58 = vpop.f32.mrb[55].mxu0  ;;  %1729 = vadd.xlane.f32.xlu0 %v1728_v4 }
 0x7df   :  { %2674 = vmatmul.mubr.msk.bf16.gmra.mrb[44].mxu1 %vm367_vm1, %v1553_v56 }
 0x7e0   :  { %v1492_v1 = vpop.f32.mrb[56].mxu0  ;;  %2677 = vmatprep.mubr.msk.bf16.mxu1 %vm3231_vm0, %v3230_v0 }
 0x7e1   :  { %v1494_v20 = vpop.f32.mrb[57].mxu0 }
 0x7e4   :  { %v1497_v38 = vpop.f32.mrb[58].mxu0 }
 0x7e5   :  { %v1554_v28 = vpack.c.bf16 %v1497_v38, %v1492_v1  ;;  %v1499_v7 = vpop.f32.mrb[59].mxu0 }
 0x7e7   :  { %2678 = vmatmul.mubr.msk.bf16.gmra.mrb[48].mxu1 %vm367_vm1, %v1554_v28 }
 0x7e8   :  { %v1502_v22 = vpop.f32.mrb[60].mxu0  ;;  %2681 = vmatprep.mubr.msk.bf16.mxu1 %vm3231_vm0, %v3230_v0 }
 0x7e9   :  { %v1504_v31 = vpop.f32.mrb[61].mxu0 }
 0x7ec   :  { %v1507_v25 = vpop.f32.mrb[62].mxu0 }
 0x7ed   :  { %v1555_v32 = vpack.c.bf16 %v1507_v25, %v1502_v22  ;;  %v1509_v10 = vpop.f32.mrb[63].mxu0 }
 0x7ef   :  { %2682 = vmatmul.mubr.msk.bf16.gmra.mrb[52].mxu1 %vm367_vm1, %v1555_v32 }
 0x7f0   :  { %v1512_v18 = vpop.f32.mrb[64].mxu0  ;;  %2685 = vmatprep.mubr.msk.bf16.mxu1 %vm3231_vm0, %v3230_v0 }
 0x7f1   :  { %v1514_v45 = vpop.f32.mrb[65].mxu0 }
 0x7f4   :  { %v1517_v51 = vpop.f32.mrb[66].mxu0 }
 0x7f5   :  { %v1556_v26 = vpack.c.bf16 %v1517_v51, %v1512_v18  ;;  %v1519_v39 = vpop.f32.mrb[67].mxu0 }
 0x7f7   :  { %2686 = vmatmul.mubr.msk.bf16.gmra.mrb[56].mxu1 %vm367_vm1, %v1556_v26 }
 0x7f8   :  { %v1522_v36 = vpop.f32.mrb[68].mxu0  ;;  %2689 = vmatprep.mubr.msk.bf16.mxu1 %vm3231_vm0, %v3230_v0 }
 0x7f9   :  { %v1524_v46 = vpop.f32.mrb[69].mxu0 }
 0x7fc   :  { %v1527_v55 = vpop.f32.mrb[70].mxu0 }
 0x7fd   :  { %v1557_v62 = vpack.c.bf16 %v1527_v55, %v1522_v36  ;;  %v1529_v42 = vpop.f32.mrb[71].mxu0 }
 0x7ff   :  { %2690 = vmatmul.mubr.msk.bf16.gmra.mrb[60].mxu1 %vm367_vm1, %v1557_v62 }
 0x800   :  { %v1532_v44 = vpop.f32.mrb[72].mxu0  ;;  %2693 = vmatprep.mubr.msk.bf16.mxu1 %vm3231_vm0, %v3230_v0 }
 0x801   :  { %v1534_v43 = vpop.f32.mrb[73].mxu0 }
 0x804   :  { %v1537_v57 = vpop.f32.mrb[74].mxu0 }
 0x805   :  { %v1558_v52 = vpack.c.bf16 %v1537_v57, %v1532_v44  ;;  %v1539_v41 = vpop.f32.mrb[75].mxu0 }
 0x807   :  { %2694 = vmatmul.mubr.msk.bf16.gmra.mrb[64].mxu1 %vm367_vm1, %v1558_v52 }
 0x808   :  { %v1542_v16 = vpop.f32.mrb[76].mxu0  ;;  %2697 = vmatprep.mubr.msk.bf16.mxu1 %vm3231_vm0, %v3230_v0 }
 0x809   :  { %v1544_v23 = vpop.f32.mrb[77].mxu0 }
 0x80c   :  { %v1547_v30 = vpop.f32.mrb[78].mxu0 }
 0x80d   :  { %v1559_v33 = vpack.c.bf16 %v1547_v30, %v1542_v16  ;;  %v1549_v37 = vpop.f32.mrb[79].mxu0 }
 0x80f   :  { %2698 = vmatmul.mubr.msk.bf16.gmra.mrb[68].mxu1 %vm367_vm1, %v1559_v33 }
 0x810   :  { %2747 = vmatprep.mubr.msk.bf16.mxu1 %vm3231_vm0, %v3230_v0 }
 0x868   :  { %v1727_v35 = vpop.xlane.xlu1 %1726 }
 0x869   :  { %v1780_v21 = vmul.f32 0.0625, %v1727_v35 }
 0x86a   :  { %v1730_v19 = vpop.xlane.xlu0 %1729 }
 0x86b   :  { %v3983_v34 = vsub.f32 %v1705_v13, %v1780_v21  ;;  %v1781_v40 = vmul.f32 0.0625, %v1730_v19 }
 0x86d   :  { %v3985_v54 = vsub.f32 %v1706_v50, %v1781_v40  ;;  %v1816_v48 = vmul.f32 %v3983_v34, %v3983_v34 }
 0x86f   :  { %v1834_v17 = vsel %vm367_vm1, %v1816_v48, 0.0  ;;  %v1817_v24 = vmul.f32 %v3985_v54, %v3985_v54 }
 0x870   :  { %1835 = vadd.xlane.f32.xlu1 %v1834_v17 }
 0x871   :  { %v1837_v29 = vsel %vm367_vm1, %v1817_v24, 0.0 }
 0x872   :  { %1838 = vadd.xlane.f32.xlu0 %v1837_v29 }
 0x8aa   :  { %v1642_v4 = vpop.f32.mrb[40].mxu1 }
 0x8ab   :  { %v1643_v56 = vadd.f32 %v3953_v53, %v1642_v4  ;;  %v2671_v13 = vpop.f32.mrb[41].mxu1 }
 0x8ac   :  { %v1645_v58 = vpop.f32.mrb[42].mxu1 }
 0x8ad   :  { %v1646_v50 = vadd.f32 %v3953_v53, %v1645_v58  ;;  %v2672_v1 = vpop.f32.mrb[43].mxu1  ;;  %v3996_v20 = vadd.f32 %v1643_v56, %v3339_v47 }
 0x8af   :  { %v1731_v38 = vsel %vm367_vm1, %v3996_v20, 0.0  ;;  %v4001_v28 = vadd.f32 %v1646_v50, %v3341_v49 }
 0x8b0   :  { %1732 = vadd.xlane.f32.xlu1 %v1731_v38 }
 0x8b1   :  { %v1734_v7 = vsel %vm367_vm1, %v4001_v28, 0.0 }
 0x8b2   :  { %1735 = vadd.xlane.f32.xlu0 %v1734_v7  ;;  %v1650_v22 = vpop.f32.mrb[44].mxu1 }
 0x8b3   :  { %v1651_v31 = vadd.f32 %v3953_v53, %v1650_v22  ;;  %v2675_v25 = vpop.f32.mrb[45].mxu1 }
 0x8b4   :  { %v1653_v32 = vpop.f32.mrb[46].mxu1 }
 0x8b5   :  { %v1654_v10 = vadd.f32 %v3953_v53, %v1653_v32  ;;  %v2676_v47 = vpop.f32.mrb[47].mxu1  ;;  %v4008_v18 = vadd.f32 %v1651_v31, %v3382_v59 }
 0x8b7   :  { %v1737_v49 = vsel %vm367_vm1, %v4008_v18, 0.0  ;;  %v4013_v45 = vadd.f32 %v1654_v10, %v3386_v61 }
 0x8b8   :  { %1738 = vadd.xlane.f32.xlu1 %v1737_v49 }
 0x8b9   :  { %v1740_v51 = vsel %vm367_vm1, %v4013_v45, 0.0 }
 0x8ba   :  { %1741 = vadd.xlane.f32.xlu0 %v1740_v51  ;;  %v1658_v26 = vpop.f32.mrb[48].mxu1 }
 0x8bb   :  { %v1659_v39 = vadd.f32 %v3953_v53, %v1658_v26  ;;  %v2679_v36 = vpop.f32.mrb[49].mxu1 }
 0x8bc   :  { %v1661_v46 = vpop.f32.mrb[50].mxu1 }
 0x8bd   :  { %v1662_v55 = vadd.f32 %v3953_v53, %v1661_v46  ;;  %v2680_v59 = vpop.f32.mrb[51].mxu1  ;;  %v4020_v62 = vadd.f32 %v1659_v39, %v3384_v60 }
 0x8bf   :  { %v1743_v61 = vsel %vm367_vm1, %v4020_v62, 0.0  ;;  %v4025_v42 = vadd.f32 %v1662_v55, %v3393_v63 }
 0x8c0   :  { %1744 = vadd.xlane.f32.xlu1 %v1743_v61 }
 0x8c1   :  { %v1746_v44 = vsel %vm367_vm1, %v4025_v42, 0.0 }
 0x8c2   :  { %1747 = vadd.xlane.f32.xlu0 %v1746_v44  ;;  %v1666_v43 = vpop.f32.mrb[52].mxu1 }
 0x8c3   :  { %v1667_v57 = vadd.f32 %v3953_v53, %v1666_v43  ;;  %v2683_v52 = vpop.f32.mrb[53].mxu1 }
 0x8c4   :  { %v1669_v41 = vpop.f32.mrb[54].mxu1 }
 0x8c5   :  { %v1670_v16 = vadd.f32 %v3953_v53, %v1669_v41  ;;  %v2684_v60 = vpop.f32.mrb[55].mxu1  ;;  %v4032_v23 = vadd.f32 %v1667_v57, %v3402_v3  ;;  %v2976_v57 = vld [vmem:[#allocation5 + $0x98] sm:$0xff]  }
 0x8c6   :  { %2740 = vmatpush3.bf16.msra.mxu1 %v2976_v57 }
 0x8c7   :  { %v1749_v63 = vsel %vm367_vm1, %v4032_v23, 0.0  ;;  %v4037_v30 = vadd.f32 %v1670_v16, %v3400_v2  ;;  %2741 = vmatprep.subr.bf16.mxu1 %v3230_v0  ;;  %v4091_v16 = vld [vmem:[#allocation7 + $0x58] ss:$0 sm:$0xff] }
 0x8c8   :  { %1750 = vadd.xlane.f32.xlu1 %v1749_v63 }
 0x8c9   :  { %v1752_v33 = vsel %vm367_vm1, %v4037_v30, 0.0 }
 0x8ca   :  { %1753 = vadd.xlane.f32.xlu0 %v1752_v33  ;;  %v1674_v37 = vpop.f32.mrb[56].mxu1 }
 0x8cb   :  { %v1675_v27 = vadd.f32 %v3953_v53, %v1674_v37  ;;  %v2687_v35 = vpop.f32.mrb[57].mxu1 }
 0x8cc   :  { %v1677_v21 = vpop.f32.mrb[58].mxu1 }
 0x8cd   :  { %v1678_v19 = vadd.f32 %v3953_v53, %v1677_v21  ;;  %v2688_v3 = vpop.f32.mrb[59].mxu1  ;;  %v4044_v40 = vadd.f32 %v1675_v27, %v3411_v6  ;;  %v4096_v27 = vld [vmem:[#allocation7 + $0x60] ss:$0 sm:$0xff] }
 0x8cf   :  { %v1755_v2 = vsel %vm367_vm1, %v4044_v40, 0.0  ;;  %v4049_v48 = vadd.f32 %v1678_v19, %v3409_v5 }
 0x8d0   :  { %1756 = vadd.xlane.f32.xlu1 %v1755_v2 }
 0x8d1   :  { %v1758_v17 = vsel %vm367_vm1, %v4049_v48, 0.0 }
 0x8d2   :  { %1759 = vadd.xlane.f32.xlu0 %v1758_v17  ;;  %v1682_v24 = vpop.f32.mrb[60].mxu1 }
 0x8d3   :  { %v1683_v29 = vadd.f32 %v3953_v53, %v1682_v24  ;;  %v2691_v4 = vpop.f32.mrb[61].mxu1 }
 0x8d4   :  { %v1685_v56 = vpop.f32.mrb[62].mxu1 }
 0x8d5   :  { %v1686_v13 = vadd.f32 %v3953_v53, %v1685_v56  ;;  %v2692_v6 = vpop.f32.mrb[63].mxu1  ;;  %v4056_v58 = vadd.f32 %v1683_v29, %v3420_v9 }
 0x8d7   :  { %v1761_v5 = vsel %vm367_vm1, %v4056_v58, 0.0  ;;  %v4061_v50 = vadd.f32 %v1686_v13, %v3418_v8 }
 0x8d8   :  { %1762 = vadd.xlane.f32.xlu1 %v1761_v5 }
 0x8d9   :  { %v1764_v1 = vsel %vm367_vm1, %v4061_v50, 0.0 }
 0x8da   :  { %1765 = vadd.xlane.f32.xlu0 %v1764_v1  ;;  %v1690_v38 = vpop.f32.mrb[64].mxu1 }
 0x8db   :  { %v1691_v7 = vadd.f32 %v3953_v53, %v1690_v38  ;;  %v2695_v22 = vpop.f32.mrb[65].mxu1 }
 0x8dc   :  { %v1693_v31 = vpop.f32.mrb[66].mxu1 }
 0x8dd   :  { %v1694_v25 = vadd.f32 %v3953_v53, %v1693_v31  ;;  %v2696_v9 = vpop.f32.mrb[67].mxu1  ;;  %v4068_v32 = vadd.f32 %v1691_v7, %v3429_v12 }
 0x8df   :  { %v1767_v8 = vsel %vm367_vm1, %v4068_v32, 0.0  ;;  %v4073_v10 = vadd.f32 %v1694_v25, %v3427_v11 }
 0x8e0   :  { %1768 = vadd.xlane.f32.xlu1 %v1767_v8 }
 0x8e1   :  { %v1770_v47 = vsel %vm367_vm1, %v4073_v10, 0.0 }
 0x8e2   :  { %1771 = vadd.xlane.f32.xlu0 %v1770_v47  ;;  %v1698_v49 = vpop.f32.mrb[68].mxu1 }
 0x8e3   :  { %v1699_v51 = vadd.f32 %v3953_v53, %v1698_v49  ;;  %v2699_v26 = vpop.f32.mrb[69].mxu1 }
 0x8e4   :  { %v1701_v39 = vpop.f32.mrb[70].mxu1 }
 0x8e5   :  { %v1702_v36 = vadd.f32 %v3953_v53, %v1701_v39  ;;  %v2700_v12 = vpop.f32.mrb[71].mxu1  ;;  %v4080_v46 = vadd.f32 %v1699_v51, %v3438_v15  ;;  %v2977_v15 = vld [vmem:[#allocation5 + $0xa0] sm:$0xff]  }
 0x8e6   :  { %2742 = vmatpush3.bf16.msra.mxu1 %v2977_v15 }
 0x8e7   :  { %v1773_v11 = vsel %vm367_vm1, %v4080_v46, 0.0  ;;  %v4085_v55 = vadd.f32 %v1702_v36, %v3436_v14  ;;  %2743 = vmatprep.subr.bf16.mxu1 %v3230_v0 }
 0x8e8   :  { %1774 = vadd.xlane.f32.xlu1 %v1773_v11 }
 0x8e9   :  { %v1776_v59 = vsel %vm367_vm1, %v4085_v55, 0.0 }
 0x8ea   :  { %1777 = vadd.xlane.f32.xlu0 %v1776_v59 }
 0x8fd   :  { %v1836_v61 = vpop.xlane.xlu1 %1835 }
 0x8fe   :  { %v1888_v44 = vmul.f32 0.0625, %v1836_v61 }
 0x8ff   :  { %v1839_v43 = vpop.xlane.xlu0 %1838 }
 0x900   :  { %v1906_v53 = vadd.f32 1e-05, %v1888_v44  ;;  %v1889_v52 = vmul.f32 0.0625, %v1839_v43 }
 0x902   :  { %3088 = vrsqrt.f32 %v1906_v53  ;;  %v1907_v41 = vadd.f32 1e-05, %v1889_v52 }
 0x904   :  { %3090 = vrsqrt.f32 %v1907_v41 }
 0x90c   :  { %v3089_v14 = vpop.eup %3088 }
 0x90d   :  { %v1942_v60 = vmul.f32 %v3089_v14, %v3983_v34 }
 0x90e   :  { %v3091_v63 = vpop.eup %3090 }
 0x90f   :  { %v1964_v33 = vmul.f32 %v4091_v16, %v1942_v60  ;;  %v1943_v37 = vmul.f32 %v3091_v63, %v3985_v54 }
 0x911   :  { %v1965_v35 = vmul.f32 %v4091_v16, %v1943_v37  ;;  %v4100_v21 = vadd.f32 %v4096_v27, %v1964_v33 }
 0x913   :  { %v4103_v19 = vadd.f32 %v4096_v27, %v1965_v35  ;;  %v2978_v35 = vld [vmem:[#allocation5 + $0xa8] sm:$0xff]  }
 0x914   :  { %2744 = vmatpush3.bf16.msra.mxu1 %v2978_v35 }
 0x915   :  { %v2004_v3 = vpack.c.bf16 %v4103_v19, %v4100_v21  ;;  %2745 = vmatprep.subr.bf16.mxu1 %v3230_v0 }
 0x917   :  { %2704 = vmatmul.mubr.msk.bf16.vlgmr.msra.gmra.mrb[80].mxu0 %vm367_vm1, %v2004_v3 }
 0x918   :  { %2707 = vmatprep.mubr.msk.bf16.mxu0 %vm3231_vm0, %v3230_v0 }
 0x93d   :  { %v1733_v34 = vpop.xlane.xlu1 %1732 }
 0x93e   :  { %v1782_v54 = vmul.f32 0.0625, %v1733_v34 }
 0x93f   :  { %v1736_v2 = vpop.xlane.xlu0 %1735 }
 0x940   :  { %v4111_v17 = vsub.f32 %v3996_v20, %v1782_v54  ;;  %v1783_v24 = vmul.f32 0.0625, %v1736_v2 }
 0x942   :  { %v4114_v29 = vsub.f32 %v4001_v28, %v1783_v24  ;;  %v1818_v4 = vmul.f32 %v4111_v17, %v4111_v17 }
 0x944   :  { %v1840_v56 = vsel %vm367_vm1, %v1818_v4, 0.0  ;;  %v1819_v13 = vmul.f32 %v4114_v29, %v4114_v29 }
 0x945   :  { %v1739_v6 = vpop.xlane.xlu1 %1738  ;;  %1841 = vadd.xlane.f32.xlu1 %v1840_v56 }
 0x946   :  { %v1784_v5 = vmul.f32 0.0625, %v1739_v6  ;;  %v1843_v1 = vsel %vm367_vm1, %v1819_v13, 0.0 }
 0x947   :  { %v1742_v38 = vpop.xlane.xlu0 %1741  ;;  %1844 = vadd.xlane.f32.xlu0 %v1843_v1 }
 0x948   :  { %v4123_v20 = vsub.f32 %v4008_v18, %v1784_v5  ;;  %v1785_v28 = vmul.f32 0.0625, %v1742_v38 }
 0x94a   :  { %v4126_v7 = vsub.f32 %v4013_v45, %v1785_v28  ;;  %v1820_v22 = vmul.f32 %v4123_v20, %v4123_v20  ;;  %v2979_v28 = vld [vmem:[#allocation5 + $0xb0] sm:$0xff]  }
 0x94b   :  { %2746 = vmatpush3.bf16.msra.mxu1 %v2979_v28 }
 0x94c   :  { %v1846_v31 = vsel %vm367_vm1, %v1820_v22, 0.0  ;;  %v1821_v25 = vmul.f32 %v4126_v7, %v4126_v7 }
 0x94d   :  { %v1745_v9 = vpop.xlane.xlu1 %1744  ;;  %1847 = vadd.xlane.f32.xlu1 %v1846_v31 }
 0x94e   :  { %v1786_v8 = vmul.f32 0.0625, %v1745_v9  ;;  %v1849_v47 = vsel %vm367_vm1, %v1821_v25, 0.0 }
 0x94f   :  { %v1748_v49 = vpop.xlane.xlu0 %1747  ;;  %1850 = vadd.xlane.f32.xlu0 %v1849_v47 }
 0x950   :  { %v4135_v18 = vsub.f32 %v4020_v62, %v1786_v8  ;;  %v1787_v45 = vmul.f32 0.0625, %v1748_v49 }
 0x952   :  { %v4138_v51 = vsub.f32 %v4025_v42, %v1787_v45  ;;  %v1822_v26 = vmul.f32 %v4135_v18, %v4135_v18 }
 0x954   :  { %v1852_v39 = vsel %vm367_vm1, %v1822_v26, 0.0  ;;  %v1823_v36 = vmul.f32 %v4138_v51, %v4138_v51 }
 0x955   :  { %v1751_v12 = vpop.xlane.xlu1 %1750  ;;  %1853 = vadd.xlane.f32.xlu1 %v1852_v39 }
 0x956   :  { %v1788_v11 = vmul.f32 0.0625, %v1751_v12  ;;  %v1855_v59 = vsel %vm367_vm1, %v1823_v36, 0.0 }
 0x957   :  { %v1754_v61 = vpop.xlane.xlu0 %1753  ;;  %1856 = vadd.xlane.f32.xlu0 %v1855_v59 }
 0x958   :  { %v4147_v62 = vsub.f32 %v4032_v23, %v1788_v11  ;;  %v1789_v42 = vmul.f32 0.0625, %v1754_v61 }
 0x95a   :  { %v4150_v44 = vsub.f32 %v4037_v30, %v1789_v42  ;;  %v1824_v43 = vmul.f32 %v4147_v62, %v4147_v62 }
 0x95c   :  { %v1858_v57 = vsel %vm367_vm1, %v1824_v43, 0.0  ;;  %v1825_v53 = vmul.f32 %v4150_v44, %v4150_v44 }
 0x95d   :  { %v1757_v52 = vpop.xlane.xlu1 %1756  ;;  %1859 = vadd.xlane.f32.xlu1 %v1858_v57 }
 0x95e   :  { %v1790_v15 = vmul.f32 0.0625, %v1757_v52  ;;  %v1861_v41 = vsel %vm367_vm1, %v1825_v53, 0.0 }
 0x95f   :  { %v1760_v14 = vpop.xlane.xlu0 %1759  ;;  %1862 = vadd.xlane.f32.xlu0 %v1861_v41 }
 0x960   :  { %v4159_v23 = vsub.f32 %v4044_v40, %v1790_v15  ;;  %v1791_v30 = vmul.f32 0.0625, %v1760_v14 }
 0x962   :  { %v4162_v60 = vsub.f32 %v4049_v48, %v1791_v30  ;;  %v1826_v63 = vmul.f32 %v4159_v23, %v4159_v23 }
 0x964   :  { %v1864_v33 = vsel %vm367_vm1, %v1826_v63, 0.0  ;;  %v1827_v37 = vmul.f32 %v4162_v60, %v4162_v60 }
 0x965   :  { %v1763_v3 = vpop.xlane.xlu1 %1762  ;;  %1865 = vadd.xlane.f32.xlu1 %v1864_v33 }
 0x966   :  { %v1792_v34 = vmul.f32 0.0625, %v1763_v3  ;;  %v1867_v54 = vsel %vm367_vm1, %v1827_v37, 0.0 }
 0x967   :  { %v1766_v40 = vpop.xlane.xlu0 %1765  ;;  %1868 = vadd.xlane.f32.xlu0 %v1867_v54 }
 0x968   :  { %v4172_v48 = vsub.f32 %v4056_v58, %v1792_v34  ;;  %v1793_v2 = vmul.f32 0.0625, %v1766_v40 }
 0x96a   :  { %v4175_v24 = vsub.f32 %v4061_v50, %v1793_v2  ;;  %v1828_v4 = vmul.f32 %v4172_v48, %v4172_v48 }
 0x96c   :  { %v1870_v56 = vsel %vm367_vm1, %v1828_v4, 0.0  ;;  %v1829_v13 = vmul.f32 %v4175_v24, %v4175_v24 }
 0x96d   :  { %v1769_v6 = vpop.xlane.xlu1 %1768  ;;  %1871 = vadd.xlane.f32.xlu1 %v1870_v56 }
 0x96e   :  { %v1794_v5 = vmul.f32 0.0625, %v1769_v6  ;;  %v1873_v1 = vsel %vm367_vm1, %v1829_v13, 0.0  ;;  %v4211_v13 = vld [vmem:[#allocation7 + $0x68] ss:$0 sm:$0xff] }
 0x96f   :  { %v1772_v38 = vpop.xlane.xlu0 %1771  ;;  %1874 = vadd.xlane.f32.xlu0 %v1873_v1 }
 0x970   :  { %v4184_v58 = vsub.f32 %v4068_v32, %v1794_v5  ;;  %v1795_v50 = vmul.f32 0.0625, %v1772_v38 }
 0x972   :  { %v4187_v22 = vsub.f32 %v4073_v10, %v1795_v50  ;;  %v1830_v31 = vmul.f32 %v4184_v58, %v4184_v58 }
 0x974   :  { %v1876_v25 = vsel %vm367_vm1, %v1830_v31, 0.0  ;;  %v1831_v9 = vmul.f32 %v4187_v22, %v4187_v22 }
 0x975   :  { %1877 = vadd.xlane.f32.xlu1 %v1876_v25  ;;  %v1775_v8 = vpop.xlane.xlu1 %1774 }
 0x976   :  { %v1796_v47 = vmul.f32 0.0625, %v1775_v8  ;;  %v1879_v32 = vsel %vm367_vm1, %v1831_v9, 0.0 }
 0x977   :  { %1880 = vadd.xlane.f32.xlu0 %v1879_v32  ;;  %v1778_v49 = vpop.xlane.xlu0 %1777 }
 0x978   :  { %v4196_v45 = vsub.f32 %v4080_v46, %v1796_v47  ;;  %v1797_v10 = vmul.f32 0.0625, %v1778_v49 }
 0x97a   :  { %v4199_v26 = vsub.f32 %v4085_v55, %v1797_v10  ;;  %v1832_v39 = vmul.f32 %v4196_v45, %v4196_v45 }
 0x97c   :  { %v1882_v36 = vsel %vm367_vm1, %v1832_v39, 0.0  ;;  %v1833_v12 = vmul.f32 %v4199_v26, %v4199_v26 }
 0x97d   :  { %1883 = vadd.xlane.f32.xlu1 %v1882_v36 }
 0x97e   :  { %v1885_v11 = vsel %vm367_vm1, %v1833_v12, 0.0 }
 0x97f   :  { %1886 = vadd.xlane.f32.xlu0 %v1885_v11 }
 0x9d2   :  { %v1842_v59 = vpop.xlane.xlu1 %1841 }
 0x9d3   :  { %v1890_v61 = vmul.f32 0.0625, %v1842_v59 }
 0x9d4   :  { %v1845_v46 = vpop.xlane.xlu0 %1844 }
 0x9d5   :  { %v1908_v42 = vadd.f32 1e-05, %v1890_v61  ;;  %v1891_v43 = vmul.f32 0.0625, %v1845_v46 }
 0x9d7   :  { %3092 = vrsqrt.f32 %v1908_v42  ;;  %v1909_v55 = vadd.f32 1e-05, %v1891_v43 }
 0x9d9   :  { %3094 = vrsqrt.f32 %v1909_v55 }
 0x9da   :  { %v1848_v57 = vpop.xlane.xlu1 %1847 }
 0x9db   :  { %v1892_v53 = vmul.f32 0.0625, %v1848_v57 }
 0x9dc   :  { %v1851_v52 = vpop.xlane.xlu0 %1850 }
 0x9dd   :  { %v1910_v15 = vadd.f32 1e-05, %v1892_v53  ;;  %v1893_v41 = vmul.f32 0.0625, %v1851_v52 }
 0x9df   :  { %3096 = vrsqrt.f32 %v1910_v15  ;;  %v1911_v14 = vadd.f32 1e-05, %v1893_v41 }
 0x9e1   :  { %v3093_v30 = vpop.eup %3092  ;;  %3098 = vrsqrt.f32 %v1911_v14 }
 0x9e2   :  { %v1944_v63 = vmul.f32 %v3093_v30, %v4111_v17  ;;  %v1854_v33 = vpop.xlane.xlu1 %1853 }
 0x9e3   :  { %v3095_v37 = vpop.eup %3094  ;;  %v1894_v35 = vmul.f32 0.0625, %v1854_v33 }
 0x9e4   :  { %v1945_v3 = vmul.f32 %v3095_v37, %v4114_v29  ;;  %v1857_v34 = vpop.xlane.xlu0 %1856  ;;  %v1966_v54 = vmul.f32 %v4091_v16, %v1944_v63 }
 0x9e5   :  { %v1912_v40 = vadd.f32 1e-05, %v1894_v35  ;;  %v1895_v2 = vmul.f32 0.0625, %v1857_v34 }
 0x9e6   :  { %v1967_v4 = vmul.f32 %v4091_v16, %v1945_v3  ;;  %v1988_v6 = vadd.f32 %v4096_v27, %v1966_v54 }
 0x9e7   :  { %3100 = vrsqrt.f32 %v1912_v40  ;;  %v1913_v56 = vadd.f32 1e-05, %v1895_v2 }
 0x9e8   :  { %v1989_v17 = vadd.f32 %v4096_v27, %v1967_v4 }
 0x9e9   :  { %v3097_v5 = vpop.eup %3096  ;;  %3102 = vrsqrt.f32 %v1913_v56 }
 0x9ea   :  { %v1946_v1 = vmul.f32 %v3097_v5, %v4123_v20  ;;  %v1860_v29 = vpop.xlane.xlu1 %1859  ;;  %v2087_v38 = vpop.f32.mrb[80].mxu0  ;;  %v2005_v50 = vpack.c.bf16 %v1989_v17, %v1988_v6 }
 0x9eb   :  { %v3099_v28 = vpop.eup %3098  ;;  %v1896_v31 = vmul.f32 0.0625, %v1860_v29  ;;  %v2088_v25 = vadd.f32 %v4211_v13, %v2087_v38  ;;  %v2705_v9 = vpop.f32.mrb[81].mxu0 }
 0x9ec   :  { %v1947_v8 = vmul.f32 %v3099_v28, %v4126_v7  ;;  %2708 = vmatmul.mubr.msk.bf16.gmra.mrb[84].mxu0 %vm367_vm1, %v2005_v50  ;;  %v1863_v47 = vpop.xlane.xlu0 %1862  ;;  %v2090_v32 = vpop.f32.mrb[82].mxu0  ;;  %v1968_v49 = vmul.f32 %v4091_v16, %v1946_v1 }
 0x9ed   :  { %v1914_v10 = vadd.f32 1e-05, %v1896_v31  ;;  %v1897_v39 = vmul.f32 0.0625, %v1863_v47  ;;  %v2091_v20 = vadd.f32 %v4211_v13, %v2090_v32  ;;  %v2706_v36 = vpop.f32.mrb[83].mxu0  ;;  %2711 = vmatprep.mubr.msk.bf16.mxu0 %vm3231_vm0, %v3230_v0  ;;  %v2158_v11 = vmax.f32 %v2088_v25, 0.0 }
 0x9ee   :  { %v1969_v12 = vmul.f32 %v4091_v16, %v1947_v8  ;;  %v1990_v61 = vadd.f32 %v4096_v27, %v1968_v49 }
 0x9ef   :  { %3104 = vrsqrt.f32 %v1914_v10  ;;  %v1915_v59 = vadd.f32 1e-05, %v1897_v39  ;;  %v2159_v7 = vmax.f32 %v2091_v20, 0.0 }
 0x9f0   :  { %v1991_v46 = vadd.f32 %v4096_v27, %v1969_v12 }
 0x9f1   :  { %v3101_v42 = vpop.eup %3100  ;;  %3106 = vrsqrt.f32 %v1915_v59  ;;  %v2176_v43 = vpack.c.bf16 %v2159_v7, %v2158_v11 }
 0x9f2   :  { %v1948_v55 = vmul.f32 %v3101_v42, %v4135_v18  ;;  %v1866_v57 = vpop.xlane.xlu1 %1865  ;;  %v2006_v53 = vpack.c.bf16 %v1991_v46, %v1990_v61 }
 0x9f3   :  { %v3103_v52 = vpop.eup %3102  ;;  %v1898_v15 = vmul.f32 0.0625, %v1866_v57  ;;  %2748 = vmatmul.mubr.msk.bf16.vlgmr.msra.gmra.mrb[72].mxu1 %vm2222_vm12, %v2176_v43 }
 0x9f4   :  { %v1949_v41 = vmul.f32 %v3103_v52, %v4138_v51  ;;  %2712 = vmatmul.mubr.msk.bf16.gmra.mrb[88].mxu0 %vm367_vm1, %v2006_v53  ;;  %v1869_v14 = vpop.xlane.xlu0 %1868  ;;  %v1970_v30 = vmul.f32 %v4091_v16, %v1948_v55  ;;  %2751 = vmatprep.mubr.msk.bf16.mxu1 %vm3231_vm0, %v3230_v0 }
 0x9f5   :  { %v1916_v63 = vadd.f32 1e-05, %v1898_v15  ;;  %v1899_v33 = vmul.f32 0.0625, %v1869_v14  ;;  %2715 = vmatprep.mubr.msk.bf16.mxu0 %vm3231_vm0, %v3230_v0 }
 0x9f6   :  { %v1971_v18 = vmul.f32 %v4091_v16, %v1949_v41  ;;  %v1992_v35 = vadd.f32 %v4096_v27, %v1970_v30 }
 0x9f7   :  { %3108 = vrsqrt.f32 %v1916_v63  ;;  %v1917_v37 = vadd.f32 1e-05, %v1899_v33 }
 0x9f8   :  { %v1993_v51 = vadd.f32 %v4096_v27, %v1971_v18 }
 0x9f9   :  { %v3105_v3 = vpop.eup %3104  ;;  %3110 = vrsqrt.f32 %v1917_v37 }
 0x9fa   :  { %v1950_v34 = vmul.f32 %v3105_v3, %v4147_v62  ;;  %v1872_v54 = vpop.xlane.xlu1 %1871  ;;  %v2007_v40 = vpack.c.bf16 %v1993_v51, %v1992_v35 }
 0x9fb   :  { %v3107_v2 = vpop.eup %3106  ;;  %v1900_v4 = vmul.f32 0.0625, %v1872_v54 }
 0x9fc   :  { %v1951_v56 = vmul.f32 %v3107_v2, %v4150_v44  ;;  %2716 = vmatmul.mubr.msk.bf16.gmra.mrb[92].mxu0 %vm367_vm1, %v2007_v40  ;;  %v1875_v6 = vpop.xlane.xlu0 %1874  ;;  %v1972_v17 = vmul.f32 %v4091_v16, %v1950_v34 }
 0x9fd   :  { %v1918_v5 = vadd.f32 1e-05, %v1900_v4  ;;  %v1901_v1 = vmul.f32 0.0625, %v1875_v6  ;;  %2719 = vmatprep.mubr.msk.bf16.mxu0 %vm3231_vm0, %v3230_v0 }
 0x9fe   :  { %v1973_v29 = vmul.f32 %v4091_v16, %v1951_v56  ;;  %v1994_v38 = vadd.f32 %v4096_v27, %v1972_v17 }
 0x9ff   :  { %3112 = vrsqrt.f32 %v1918_v5  ;;  %v1919_v62 = vadd.f32 1e-05, %v1901_v1 }
 0xa00   :  { %v1995_v50 = vadd.f32 %v4096_v27, %v1973_v29 }
 0xa01   :  { %v3109_v28 = vpop.eup %3108  ;;  %3114 = vrsqrt.f32 %v1919_v62 }
 0xa02   :  { %v1952_v44 = vmul.f32 %v3109_v28, %v4159_v23  ;;  %v1878_v31 = vpop.xlane.xlu1 %1877  ;;  %v2008_v25 = vpack.c.bf16 %v1995_v50, %v1994_v38  ;;  %v2508_v50 = vld [vmem:[#allocation7 + $0x70] ss:$0 sm:$0xff] }
 0xa03   :  { %v3111_v9 = vpop.eup %3110  ;;  %v1902_v8 = vmul.f32 0.0625, %v1878_v31 }
 0xa04   :  { %v1953_v47 = vmul.f32 %v3111_v9, %v4162_v60  ;;  %2720 = vmatmul.mubr.msk.bf16.gmra.mrb[96].mxu0 %vm367_vm1, %v2008_v25  ;;  %v1881_v32 = vpop.xlane.xlu0 %1880  ;;  %v1974_v49 = vmul.f32 %v4091_v16, %v1952_v44 }
 0xa05   :  { %v1920_v10 = vadd.f32 1e-05, %v1902_v8  ;;  %v1903_v39 = vmul.f32 0.0625, %v1881_v32  ;;  %2723 = vmatprep.mubr.msk.bf16.mxu0 %vm3231_vm0, %v3230_v0 }
 0xa06   :  { %v1975_v20 = vmul.f32 %v4091_v16, %v1953_v47  ;;  %v1996_v36 = vadd.f32 %v4096_v27, %v1974_v49 }
 0xa07   :  { %3116 = vrsqrt.f32 %v1920_v10  ;;  %v1921_v23 = vadd.f32 1e-05, %v1903_v39 }
 0xa08   :  { %v1997_v12 = vadd.f32 %v4096_v27, %v1975_v20 }
 0xa09   :  { %v3113_v11 = vpop.eup %3112  ;;  %3118 = vrsqrt.f32 %v1921_v23 }
 0xa0a   :  { %v1954_v60 = vmul.f32 %v3113_v11, %v4172_v48  ;;  %v1884_v59 = vpop.xlane.xlu1 %1883  ;;  %v2009_v7 = vpack.c.bf16 %v1997_v12, %v1996_v36 }
 0xa0b   :  { %v3115_v61 = vpop.eup %3114  ;;  %v1904_v46 = vmul.f32 0.0625, %v1884_v59 }
 0xa0c   :  { %v1955_v42 = vmul.f32 %v3115_v61, %v4175_v24  ;;  %2724 = vmatmul.mubr.msk.bf16.gmra.mrb[100].mxu0 %vm367_vm1, %v2009_v7  ;;  %v1887_v43 = vpop.xlane.xlu0 %1886  ;;  %v1976_v55 = vmul.f32 %v4091_v16, %v1954_v60 }
 0xa0d   :  { %v1922_v57 = vadd.f32 1e-05, %v1904_v46  ;;  %v1905_v53 = vmul.f32 0.0625, %v1887_v43  ;;  %2727 = vmatprep.mubr.msk.bf16.mxu0 %vm3231_vm0, %v3230_v0 }
 0xa0e   :  { %v1977_v52 = vmul.f32 %v4091_v16, %v1955_v42  ;;  %v1998_v15 = vadd.f32 %v4096_v27, %v1976_v55 }
 0xa0f   :  { %3120 = vrsqrt.f32 %v1922_v57  ;;  %v1923_v48 = vadd.f32 1e-05, %v1905_v53 }
 0xa10   :  { %v1999_v41 = vadd.f32 %v4096_v27, %v1977_v52 }
 0xa11   :  { %v3117_v14 = vpop.eup %3116  ;;  %3122 = vrsqrt.f32 %v1923_v48 }
 0xa12   :  { %v1956_v24 = vmul.f32 %v3117_v14, %v4184_v58  ;;  %v2010_v30 = vpack.c.bf16 %v1999_v41, %v1998_v15 }
 0xa13   :  { %v3119_v63 = vpop.eup %3118 }
 0xa14   :  { %v1957_v33 = vmul.f32 %v3119_v63, %v4187_v22  ;;  %2728 = vmatmul.mubr.msk.bf16.gmra.mrb[104].mxu0 %vm367_vm1, %v2010_v30  ;;  %v1978_v18 = vmul.f32 %v4091_v16, %v1956_v24 }
 0xa15   :  { %2731 = vmatprep.mubr.msk.bf16.mxu0 %vm3231_vm0, %v3230_v0 }
 0xa16   :  { %v1979_v37 = vmul.f32 %v4091_v16, %v1957_v33  ;;  %v2000_v35 = vadd.f32 %v4096_v27, %v1978_v18 }
 0xa18   :  { %v2001_v51 = vadd.f32 %v4096_v27, %v1979_v37 }
 0xa19   :  { %v3121_v3 = vpop.eup %3120 }
 0xa1a   :  { %v1958_v58 = vmul.f32 %v3121_v3, %v4196_v45  ;;  %v2011_v34 = vpack.c.bf16 %v2001_v51, %v2000_v35 }
 0xa1b   :  { %v3123_v54 = vpop.eup %3122 }
 0xa1c   :  { %v1959_v22 = vmul.f32 %v3123_v54, %v4199_v26  ;;  %2732 = vmatmul.mubr.msk.bf16.gmra.mrb[108].mxu0 %vm367_vm1, %v2011_v34  ;;  %v1980_v40 = vmul.f32 %v4091_v16, %v1958_v58 }
 0xa1d   :  { %2735 = vmatprep.mubr.msk.bf16.mxu0 %vm3231_vm0, %v3230_v0 }
 0xa1e   :  { %v1981_v2 = vmul.f32 %v4091_v16, %v1959_v22  ;;  %v2002_v4 = vadd.f32 %v4096_v27, %v1980_v40 }
 0xa20   :  { %v2003_v56 = vadd.f32 %v4096_v27, %v1981_v2 }
 0xa22   :  { %v2012_v6 = vpack.c.bf16 %v2003_v56, %v2002_v4 }
 0xa24   :  { %2736 = vmatmul.mubr.msk.bf16.gmra.mrb[112].mxu0 %vm367_vm1, %v2012_v6 }
 0xabf   :  { %v2095_v45 = vpop.f32.mrb[84].mxu0 }
 0xac0   :  { %v2096_v17 = vadd.f32 %v4211_v13, %v2095_v45  ;;  %v2709_v26 = vpop.f32.mrb[85].mxu0 }
 0xac1   :  { %v2098_v5 = vpop.f32.mrb[86].mxu0 }
 0xac2   :  { %v2099_v1 = vadd.f32 %v4211_v13, %v2098_v5  ;;  %v2710_v29 = vpop.f32.mrb[87].mxu0  ;;  %v2160_v62 = vmax.f32 %v2096_v17, 0.0 }
 0xac4   :  { %v2161_v38 = vmax.f32 %v2099_v1, 0.0 }
 0xac6   :  { %v2177_v28 = vpack.c.bf16 %v2161_v38, %v2160_v62  ;;  %v2284_v16 = vpop.f32.mrb[72].mxu1 }
 0xac7   :  { %v2103_v44 = vpop.f32.mrb[88].mxu0  ;;  %v2285_v31 = vadd.f32 %v2508_v50, %v2284_v16  ;;  %v2749_v25 = vpop.f32.mrb[73].mxu1 }
 0xac8   :  { %v2104_v27 = vadd.f32 %v4211_v13, %v2103_v44  ;;  %v2713_v9 = vpop.f32.mrb[89].mxu0  ;;  %2752 = vmatmul.mubr.msk.bf16.gmra.mrb[76].mxu1 %vm2222_vm12, %v2177_v28  ;;  %v2287_v8 = vpop.f32.mrb[74].mxu1 }
 0xac9   :  { %v4289_v47 = vadd.f32 %v2285_v31, %v4100_v21  ;;  %v2106_v32 = vpop.f32.mrb[90].mxu0  ;;  %v2288_v49 = vadd.f32 %v2508_v50, %v2287_v8  ;;  %v2750_v10 = vpop.f32.mrb[75].mxu1  ;;  %2755 = vmatprep.mubr.msk.bf16.mxu1 %vm3231_vm0, %v3230_v0 }
 0xaca   :  { %v2107_v39 = vadd.f32 %v4211_v13, %v2106_v32  ;;  %v2714_v20 = vpop.f32.mrb[91].mxu0  ;;  %v2162_v12 = vmax.f32 %v2104_v27, 0.0 }
 0xacb   :  { %v4295_v23 = vadd.f32 %v2288_v49, %v4103_v19  ;;  %v2343_v36 = vsel %vm367_vm1, %v4289_v47, 0.0 }
 0xacc   :  { %v2163_v11 = vmax.f32 %v2107_v39, 0.0  ;;  %2344 = vadd.xlane.f32.xlu1 %v2343_v36 }
 0xacd   :  { %v2346_v21 = vsel %vm367_vm1, %v4295_v23, 0.0 }
 0xace   :  { %v2178_v60 = vpack.c.bf16 %v2163_v11, %v2162_v12  ;;  %2347 = vadd.xlane.f32.xlu0 %v2346_v21 }
 0xacf   :  { %v2111_v59 = vpop.f32.mrb[92].mxu0 }
 0xad0   :  { %v2112_v7 = vadd.f32 %v4211_v13, %v2111_v59  ;;  %v2717_v61 = vpop.f32.mrb[93].mxu0  ;;  %2756 = vmatmul.mubr.msk.bf16.gmra.mrb[80].mxu1 %vm2222_vm12, %v2178_v60 }
 0xad1   :  { %v2114_v46 = vpop.f32.mrb[94].mxu0  ;;  %2759 = vmatprep.mubr.msk.bf16.mxu1 %vm3231_vm0, %v3230_v0  ;;  %v3240_v61 = vmov 0  }
 0xad2   :  { %v2115_v19 = vadd.f32 %v4211_v13, %v2114_v46  ;;  %v2718_v42 = vpop.f32.mrb[95].mxu0  ;;  %v2164_v43 = vmax.f32 %v2112_v7, 0.0  ;;  %2955 = vset.pattern.permute.xlu0 %v3240_v61 }
 0xad4   :  { %v2165_v55 = vmax.f32 %v2115_v19, 0.0 }
 0xad6   :  { %v2179_v57 = vpack.c.bf16 %v2165_v55, %v2164_v43 }
 0xad7   :  { %v2119_v53 = vpop.f32.mrb[96].mxu0 }
 0xad8   :  { %v2120_v52 = vadd.f32 %v4211_v13, %v2119_v53  ;;  %v2721_v48 = vpop.f32.mrb[97].mxu0  ;;  %2760 = vmatmul.mubr.msk.bf16.gmra.mrb[84].mxu1 %vm2222_vm12, %v2179_v57 }
 0xad9   :  { %v2122_v15 = vpop.f32.mrb[98].mxu0  ;;  %2763 = vmatprep.mubr.msk.bf16.mxu1 %vm3231_vm0, %v3230_v0 }
 0xada   :  { %v2123_v41 = vadd.f32 %v4211_v13, %v2122_v15  ;;  %v2722_v14 = vpop.f32.mrb[99].mxu0  ;;  %v2166_v24 = vmax.f32 %v2120_v52, 0.0 }
 0xadc   :  { %v2167_v30 = vmax.f32 %v2123_v41, 0.0 }
 0xade   :  { %v2180_v63 = vpack.c.bf16 %v2167_v30, %v2166_v24 }
 0xadf   :  { %v2127_v33 = vpop.f32.mrb[100].mxu0 }
 0xae0   :  { %v2128_v18 = vadd.f32 %v4211_v13, %v2127_v33  ;;  %v2725_v37 = vpop.f32.mrb[101].mxu0  ;;  %2764 = vmatmul.mubr.msk.bf16.gmra.mrb[88].mxu1 %vm2222_vm12, %v2180_v63 }
 0xae1   :  { %v2130_v35 = vpop.f32.mrb[102].mxu0  ;;  %2767 = vmatprep.mubr.msk.bf16.mxu1 %vm3231_vm0, %v3230_v0 }
 0xae2   :  { %v2131_v51 = vadd.f32 %v4211_v13, %v2130_v35  ;;  %v2726_v3 = vpop.f32.mrb[103].mxu0  ;;  %v2168_v58 = vmax.f32 %v2128_v18, 0.0 }
 0xae4   :  { %v2169_v34 = vmax.f32 %v2131_v51, 0.0 }
 0xae6   :  { %v2181_v54 = vpack.c.bf16 %v2169_v34, %v2168_v58 }
 0xae7   :  { %v2135_v22 = vpop.f32.mrb[104].mxu0 }
 0xae8   :  { %v2136_v40 = vadd.f32 %v4211_v13, %v2135_v22  ;;  %v2729_v2 = vpop.f32.mrb[105].mxu0  ;;  %2768 = vmatmul.mubr.msk.bf16.gmra.mrb[92].mxu1 %vm2222_vm12, %v2181_v54 }
 0xae9   :  { %v2138_v4 = vpop.f32.mrb[106].mxu0  ;;  %2771 = vmatprep.mubr.msk.bf16.mxu1 %vm3231_vm0, %v3230_v0 }
 0xaea   :  { %v2139_v56 = vadd.f32 %v4211_v13, %v2138_v4  ;;  %v2730_v6 = vpop.f32.mrb[107].mxu0  ;;  %v2170_v45 = vmax.f32 %v2136_v40, 0.0 }
 0xaec   :  { %v2171_v17 = vmax.f32 %v2139_v56, 0.0 }
 0xaee   :  { %v2182_v26 = vpack.c.bf16 %v2171_v17, %v2170_v45 }
 0xaef   :  { %v2143_v5 = vpop.f32.mrb[108].mxu0 }
 0xaf0   :  { %v2144_v1 = vadd.f32 %v4211_v13, %v2143_v5  ;;  %v2733_v29 = vpop.f32.mrb[109].mxu0  ;;  %2772 = vmatmul.mubr.msk.bf16.gmra.mrb[96].mxu1 %vm2222_vm12, %v2182_v26 }
 0xaf1   :  { %v2146_v62 = vpop.f32.mrb[110].mxu0  ;;  %2775 = vmatprep.mubr.msk.bf16.mxu1 %vm3231_vm0, %v3230_v0 }
 0xaf2   :  { %v2147_v38 = vadd.f32 %v4211_v13, %v2146_v62  ;;  %v2734_v50 = vpop.f32.mrb[111].mxu0  ;;  %v2172_v28 = vmax.f32 %v2144_v1, 0.0 }
 0xaf4   :  { %v2173_v16 = vmax.f32 %v2147_v38, 0.0  ;;  %v2522_v38 = vld [vmem:[#allocation7 + $0x78] ss:$0 sm:$0xff] }
 0xaf6   :  { %v2183_v44 = vpack.c.bf16 %v2173_v16, %v2172_v28  ;;  %v2523_v16 = vld [vmem:[#allocation7 + $0x80] ss:$0 sm:$0xff] }
 0xaf7   :  { %v2151_v31 = vpop.f32.mrb[112].mxu0 }
 0xaf8   :  { %v2152_v25 = vadd.f32 %v4211_v13, %v2151_v31  ;;  %v2737_v27 = vpop.f32.mrb[113].mxu0  ;;  %2776 = vmatmul.mubr.msk.bf16.gmra.mrb[100].mxu1 %vm2222_vm12, %v2183_v44 }
 0xaf9   :  { %v2154_v9 = vpop.f32.mrb[114].mxu0  ;;  %2779 = vmatprep.mubr.msk.bf16.mxu1 %vm3231_vm0, %v3230_v0 }
 0xafa   :  { %v2155_v8 = vadd.f32 %v4211_v13, %v2154_v9  ;;  %v2738_v32 = vpop.f32.mrb[115].mxu0  ;;  %v2174_v49 = vmax.f32 %v2152_v25, 0.0 }
 0xafc   :  { %v2175_v10 = vmax.f32 %v2155_v8, 0.0 }
 0xafe   :  { %v2184_v39 = vpack.c.bf16 %v2175_v10, %v2174_v49 }
 0xb00   :  { %2780 = vmatmul.mubr.msk.bf16.gmra.mrb[104].mxu1 %vm2222_vm12, %v2184_v39 }
 0xb59   :  { %v2345_v20 = vpop.xlane.xlu1 %2344 }
 0xb5a   :  { %v2349_v36 = vmul.f32 0.0625, %v2345_v20 }
 0xb5b   :  { %v2348_v12 = vpop.xlane.xlu0 %2347 }
 0xb5c   :  { %v2351_v11 = vsub.f32 %v4289_v47, %v2349_v36  ;;  %v2350_v21 = vmul.f32 0.0625, %v2348_v12 }
 0xb5e   :  { %v2352_v60 = vsub.f32 %v4295_v23, %v2350_v21  ;;  %v2353_v59 = vmul.f32 %v2351_v11, %v2351_v11 }
 0xb60   :  { %v2355_v7 = vsel %vm367_vm1, %v2353_v59, 0.0  ;;  %v2354_v0 = vmul.f32 %v2352_v60, %v2352_v60 }
 0xb61   :  { %2356 = vadd.xlane.f32.xlu1 %v2355_v7 }
 0xb62   :  { %v2358_v13 = vsel %vm367_vm1, %v2354_v0, 0.0 }
 0xb63   :  { %2359 = vadd.xlane.f32.xlu0 %v2358_v13 }
 0xb9b   :  { %v2292_v46 = vpop.f32.mrb[76].mxu1 }
 0xb9c   :  { %v2753_v19 = vpop.f32.mrb[77].mxu1 }
 0xb9d   :  { %v2294_v42 = vpop.f32.mrb[78].mxu1 }
 0xb9e   :  { %v2754_v43 = vpop.f32.mrb[79].mxu1 }
 0xba3   :  { %v2298_v55 = vpop.f32.mrb[80].mxu1 }
 0xba4   :  { %v2757_v57 = vpop.f32.mrb[81].mxu1 }
 0xba5   :  { %v2300_v47 = vpop.f32.mrb[82].mxu1 }
 0xba6   :  { %v2758_v53 = vpop.f32.mrb[83].mxu1 }
 0xbab   :  { %v2304_v52 = vpop.f32.mrb[84].mxu1 }
 0xbac   :  { %v2761_v23 = vpop.f32.mrb[85].mxu1 }
 0xbad   :  { %v2306_v48 = vpop.f32.mrb[86].mxu1 }
 0xbae   :  { %v2762_v15 = vpop.f32.mrb[87].mxu1 }
 0xbb3   :  { %v2310_v41 = vpop.f32.mrb[88].mxu1 }
 0xbb4   :  { %v2765_v14 = vpop.f32.mrb[89].mxu1 }
 0xbb5   :  { %v2312_v24 = vpop.f32.mrb[90].mxu1 }
 0xbb6   :  { %v2766_v30 = vpop.f32.mrb[91].mxu1 }
 0xbbb   :  { %v2316_v63 = vpop.f32.mrb[92].mxu1 }
 0xbbc   :  { %v2769_v33 = vpop.f32.mrb[93].mxu1 }
 0xbbd   :  { %v2318_v18 = vpop.f32.mrb[94].mxu1 }
 0xbbe   :  { %v2770_v37 = vpop.f32.mrb[95].mxu1 }
 0xbc3   :  { %v2322_v35 = vpop.f32.mrb[96].mxu1 }
 0xbc4   :  { %v2773_v51 = vpop.f32.mrb[97].mxu1 }
 0xbc5   :  { %v2324_v3 = vpop.f32.mrb[98].mxu1 }
 0xbc6   :  { %v2774_v58 = vpop.f32.mrb[99].mxu1 }
 0xbcb   :  { %v2328_v34 = vpop.f32.mrb[100].mxu1 }
 0xbcc   :  { %v2777_v54 = vpop.f32.mrb[101].mxu1 }
 0xbcd   :  { %v2330_v22 = vpop.f32.mrb[102].mxu1 }
 0xbce   :  { %v2778_v40 = vpop.f32.mrb[103].mxu1 }
 0xbd3   :  { %v2334_v2 = vpop.f32.mrb[104].mxu1 }
 0xbd4   :  { %v2781_v4 = vpop.f32.mrb[105].mxu1 }
 0xbd5   :  { %v2336_v56 = vpop.f32.mrb[106].mxu1 }
 0xbd6   :  { %v2782_v6 = vpop.f32.mrb[107].mxu1 }
 0xbee   :  { %v2357_v45 = vpop.xlane.xlu1 %2356 }
 0xbef   :  { %v2361_v17 = vmul.f32 0.0625, %v2357_v45 }
 0xbf0   :  { %v2360_v26 = vpop.xlane.xlu0 %2359 }
 0xbf1   :  { %v2363_v5 = vadd.f32 1e-05, %v2361_v17  ;;  %v2362_v1 = vmul.f32 0.0625, %v2360_v26 }
 0xbf3   :  { %3124 = vrsqrt.f32 %v2363_v5  ;;  %v2364_v29 = vadd.f32 1e-05, %v2362_v1 }
 0xbf5   :  { %3126 = vrsqrt.f32 %v2364_v29 }
 0xbfd   :  { %v3125_v62 = vpop.eup %3124 }
 0xbfe   :  { %v2367_v50 = vmul.f32 %v3125_v62, %v2351_v11 }
 0xbff   :  { %v3127_v28 = vpop.eup %3126 }
 0xc00   :  { %v2368_v44 = vmul.f32 %v3127_v28, %v2352_v60  ;;  %v2373_v31 = vmul.f32 %v2522_v38, %v2367_v50 }
 0xc02   :  { %v2374_v25 = vmul.f32 %v2522_v38, %v2368_v44  ;;  %v2379_v27 = vadd.f32 %v2523_v16, %v2373_v31 }
 0xc04   :  { %v2380_v9 = vadd.f32 %v2523_v16, %v2374_v25  ;;  %2381 = vst.msk [vmem:[#allocation8] sm:$0xff] %vm367_vm1, %v2379_v27 }
 0xc06   :  { %2382 = vst.msk [vmem:[#allocation8 + $0x8] sm:$0xff] %vm367_vm1, %v2380_v9 }
 0xc07   :  { %3206 = shalt.err (!%p3203_p0)
}
 0xc08   :  { %s3207_s6 = scalar_lea.hbm %s4356_s3, 256 }
 0xc09   :  { %p3208_p1 = scmp.ne.s32.totalorder %s4356_s3, %s3207_s6  ;;  %p3211_p2 = scmp.lt.u32.totalorder %s3207_s6, %s4356_s3 }
 0xc0b   :  { %p3213_p3 = pnand %p3211_p2, %p3208_p1 }
 0xc0d   :  { %3216 = shalt.err (!%p3213_p3)
}
 0xc0e   :  { %2394 = dma.vmem_to_hbm [thread:$0]  %s2389_s29, 256, %s4356_s3, [#allocation4], %s3228_s0, %s3228_s0, %s3229_s15  }
 0xc0f   :  { %3221 = dma.done.wait [#allocation4], 256  }
 0xc10   :  { %3222 = vsyncadd [#allocation4], 4294967040 }
 0xc11   :  { %2398 = vsyncpa [#allocation3], 1 }
 0xc12   :  { %2399 = vsyncpa [#allocation6], 1 }
 0xc13   :  { %2400 = vsyncpa [#allocation4], 1 }

</bundles_post_ra>
